<compile_context>
chip_gen: v7x
topology: tpu7x:2x2x1
jax: 0.10.0
libtpu: 0.0.40
codegen_flags: <defaults>
</compile_context>

<pallas_src>
import math
import functools

import jax
import jax.numpy as jnp
from jax.experimental import pallas as pl
from jax.experimental.pallas import tpu as pltpu


def _layer_norm(x, gamma, beta, eps=1e-5):
    # x: (rows, D) f32, gamma/beta: (1, D). PyTorch LayerNorm uses biased variance.
    mean = jnp.mean(x, axis=-1, keepdims=True)
    xc = x - mean
    var = jnp.mean(xc * xc, axis=-1, keepdims=True)
    return xc * jax.lax.rsqrt(var + eps) * gamma + beta


def encoder_unit_kernel(
    x_ref,
    wq_ref, bq_ref, wk_ref, bk_ref, wv_ref, bv_ref,
    wo_ref, bo_ref,
    ln_g_ref, ln_b_ref,
    w1_ref, b1_ref, w2_ref, b2_ref,
    o_ref,
    k_sc, v_sc, y_sc, yb_sc, ffn_sc,
    *, num_heads, q_tile,
):
    f32 = jnp.float32
    bf16 = jnp.bfloat16
    S, D = x_ref.shape[1], x_ref.shape[2]
    H = num_heads
    dh = D // H
    tq = q_tile
    scale = 1.0 / math.sqrt(dh)

    qi = pl.program_id(1)          # query-block index (sequential per batch)
    fi = pl.program_id(2)          # d_ff chunk index (innermost, sequential)

    def heads(t, rows):
        # (rows, D) -> (H, rows, dh) bf16 with a single relayout
        # (replaces the previous stack-of-H-lane-slices head split).
        return jnp.transpose(t.astype(bf16).reshape(rows, H, dh), (1, 0, 2))

    # ---- attention + first residual/LayerNorm: once per (batch, q-block) ----
    @pl.when(fi == 0)
    def _attention():
        # K/V projections for the whole sequence: once per batch element,
        # stored head-major in bf16 scratch and reused by every query block.
        @pl.when(qi == 0)
        def _kv():
            xb = x_ref[0].astype(bf16)                                    # (S, D)
            k = jnp.dot(xb, wk_ref[...], preferred_element_type=f32) + bk_ref[...]
            v = jnp.dot(xb, wv_ref[...], preferred_element_type=f32) + bv_ref[...]
            k_sc[...] = heads(k, S)                                       # (H, S, dh)
            v_sc[...] = heads(v, S)

        # Q projection + attention for this query block only.
        q_start = pl.multiple_of(qi * tq, tq)
        x_blk = x_ref[0, pl.ds(q_start, tq), :]                           # (tq, D) f32
        q = jnp.dot(x_blk.astype(bf16), wq_ref[...],
                    preferred_element_type=f32) + bq_ref[...]
        # Fold 1/sqrt(dh) into q: tq*D multiplies instead of H*tq*S on scores.
        qh = heads(q * scale, tq)                                         # (H, tq, dh)

        s = jnp.einsum("hqe,hke->hqk", qh, k_sc[...],
                       preferred_element_type=f32)                        # (H, tq, S)
        m = jnp.max(s, axis=-1, keepdims=True)
        e = jnp.exp(s - m)
        p = e * pl.reciprocal(jnp.sum(e, axis=-1, keepdims=True), approx=True)

        ctx = jnp.einsum("hqk,hke->hqe", p.astype(bf16), v_sc[...],
                         preferred_element_type=f32)                      # (H, tq, dh)
        # Merge heads with one relayout and do the output projection as a
        # single (tq, D) x (D, D) MXU matmul: the head reduction happens inside
        # the MXU accumulator (no (H, S, D) f32 intermediate, no VPU head-sum).
        ctx_md = jnp.transpose(ctx, (1, 0, 2)).reshape(tq, D).astype(bf16)
        attn = jnp.dot(ctx_md, wo_ref[...],
                       preferred_element_type=f32) + bo_ref[...]          # (tq, D)

        y = _layer_norm(x_blk + attn, ln_g_ref[...], ln_b_ref[...])
        y_sc[...] = y                        # f32 copy for the second residual
        yb_sc[...] = y.astype(bf16)          # bf16 copy reused by every FFN chunk
        ffn_sc[...] = jnp.zeros_like(ffn_sc)

    # ---- FFN streamed over d_ff chunks (innermost grid axis, sequential) ----
    h1 = jnp.dot(yb_sc[...], w1_ref[...], preferred_element_type=f32) + b1_ref[...]
    h1 = jnp.maximum(h1, 0.0)                # ReLU (per-column, chunkable)
    ffn_sc[...] += jnp.dot(h1.astype(bf16), w2_ref[...], preferred_element_type=f32)

    # ---- second residual + LayerNorm (same shared LN params, as in the module) ----
    @pl.when(fi == pl.num_programs(2) - 1)
    def _finalize():
        z = _layer_norm(y_sc[...] + ffn_sc[...] + b2_ref[...],
                        ln_g_ref[...], ln_b_ref[...])
        o_ref[0] = z.astype(o_ref.dtype)


def _q_tile(s):
    # Large M per MXU pass amortizes the under-filled K/N (= dh) dims; 256 is
    # the sweet spot called out for v6e/v7x.  Fall back to full S if nothing
    # divides (nq = 1, same as the un-blocked kernel).
    for t in (256, 128, 64, 32, 16, 8):
        if s % t == 0:
            return t
    return s


def _ff_tile(d_ff, d_model):
    # Prefer the largest 128-multiple chunk whose streamed, double-buffered
    # footprint (w1 chunk + w2 chunk, bf16, 2 buffers each ~= 8*D*t bytes)
    # stays modest, so big chips (v5e/v6e) take fewer grid steps.
    for t in (1024, 512, 256, 128):
        if d_ff % t == 0 and 8 * d_model * t <= 8 * 1024 * 1024:
            return t
    if d_ff % 128 == 0:
        return 128
    # Footprint cliff guard: a non-128-multiple d_ff makes w1/w2 fully resident
    # (nf = 1); only allow that for small hidden sizes -- otherwise pad d_ff.
    assert d_ff <= 1024, (
        "d_ff should be a multiple of 128 (pad it) so the FFN stays streamed")
    return d_ff


def _vmem_limit_bytes():
    # ~80% of physical VMEM: ~51 MiB on v7x (64 MiB/TC), ~102 MiB on v5e/v6e
    # (128 MiB).  Never hand the compiler the full physical capacity.
    try:
        cap = pltpu.get_tpu_info().vmem_capacity_bytes
        return int(cap * 0.8)
    except Exception:
        return 48 * 1024 * 1024  # conservative default that fits every generation


def transformer_encoder_unit(x, params, *, num_heads):
    B, S, D = x.shape
    d_ff = params["w1"].shape[-1]
    assert D % num_heads == 0
    dh = D // num_heads
    tq = _q_tile(S)
    nq = S // tq
    tk_ff = _ff_tile(d_ff, D)
    nf = d_ff // tk_ff
    bf16 = jnp.bfloat16

    # bf16 MXU operands: halves weight VMEM footprint & DMA traffic.
    # Biases / LN params stay f32.
    wq = params["wq"].astype(bf16)
    wk = params["wk"].astype(bf16)
    wv = params["wv"].astype(bf16)
    wo = params["wo"].astype(bf16)
    w1 = params["w1"].astype(bf16)
    w2 = params["w2"].astype(bf16)

    # TODO(synk): single-buffer (pipeline_mode=pl.Buffered(1)) the grid-invariant
    # weight specs to halve their double-buffer VMEM footprint once that is
    # reliably supported by top-level pallas_call pipelining.
    def const2(shape):
        return pl.BlockSpec(shape, lambda b, q, f: (0, 0))

    in_specs = [
        pl.BlockSpec((1, S, D), lambda b, q, f: (b, 0, 0)),    # x (full seq, per batch)
        const2((D, D)), const2((1, D)),                        # wq, bq
        const2((D, D)), const2((1, D)),                        # wk, bk
        const2((D, D)), const2((1, D)),                        # wv, bv
        const2((D, D)), const2((1, D)),                        # wo, bo
        const2((1, D)), const2((1, D)),                        # ln gamma, beta
        pl.BlockSpec((D, tk_ff), lambda b, q, f: (0, f)),      # w1 chunk (streamed)
        pl.BlockSpec((1, tk_ff), lambda b, q, f: (0, f)),      # b1 chunk
        pl.BlockSpec((tk_ff, D), lambda b, q, f: (f, 0)),      # w2 chunk (streamed)
        const2((1, D)),                                        # b2
    ]

    # Advisory cost estimate (QKV + scores + PV + out-proj + FFN matmul flops).
    flops = 2 * B * S * (4 * D * D + 2 * S * D + 2 * D * d_ff)
    transcendentals = B * (num_heads * S * S + num_heads * S + 2 * S)
    bytes_accessed = (2 * B * S * D) * 4 + (4 * D * D + 2 * D * d_ff) * 2 + (6 * D + d_ff) * 4

    kernel = functools.partial(encoder_unit_kernel, num_heads=num_heads, q_tile=tq)

    # TODO(synk): for very long S add KV blocking with online softmax so the
    # (H, tq, S) score block and the (H, S, dh) K/V scratch shrink further.
    return pl.pallas_call(
        kernel,
        out_shape=jax.ShapeDtypeStruct((B, S, D), jnp.float32),
        grid_spec=pltpu.PrefetchScalarGridSpec(
            num_scalar_prefetch=0,
            grid=(B, nq, nf),                  # reduction (d_ff) axis last
            in_specs=in_specs,
            out_specs=pl.BlockSpec((1, tq, D), lambda b, q, f: (b, q, 0)),
            scratch_shapes=[
                pltpu.VMEM((num_heads, S, dh), bf16),   # K, head-major, per batch
                pltpu.VMEM((num_heads, S, dh), bf16),   # V, head-major, per batch
                pltpu.VMEM((tq, D), jnp.float32),       # y (post-LN1), f32 residual copy
                pltpu.VMEM((tq, D), bf16),              # y cached in bf16 for FFN chunks
                pltpu.VMEM((tq, D), jnp.float32),       # FFN f32 accumulator
            ],
        ),
        compiler_params=pltpu.CompilerParams(
            # qi and fi must stay sequential (K/V scratch filled at qi==0,
            # ffn_sc accumulated over fi); only batch is megacore-parallel.
            dimension_semantics=("parallel", "arbitrary", "arbitrary"),
            vmem_limit_bytes=_vmem_limit_bytes(),
        ),
        cost_estimate=pl.CostEstimate(
            flops=flops, transcendentals=transcendentals, bytes_accessed=bytes_accessed),
    )(
        x,
        wq, params["bq"], wk, params["bk"], wv, params["bv"],
        wo, params["bo"],
        params["ln_g"], params["ln_b"],
        w1, params["b1"], w2, params["b2"],
    )


def reference_forward(x, params, *, num_heads):
    # Pure-JAX reference mirroring the kernel's bf16-operand / f32-accumulate matmuls.
    B, S, D = x.shape
    dh = D // num_heads
    bf16 = jnp.bfloat16
    f32 = jnp.float32
    scale = 1.0 / math.sqrt(dh)

    def mm(a, w):
        return jnp.dot(a.astype(bf16), w.astype(bf16), preferred_element_type=f32)

    def ln(y):
        mean = jnp.mean(y, axis=-1, keepdims=True)
        var = jnp.mean((y - mean) ** 2, axis=-1, keepdims=True)
        return (y - mean) * jax.lax.rsqrt(var + 1e-5) * params["ln_g"] + params["ln_b"]

    q = (mm(x, params["wq"]) + params["bq"]) * scale
    k = mm(x, params["wk"]) + params["bk"]
    v = mm(x, params["wv"]) + params["bv"]
    qh = q.reshape(B, S, num_heads, dh).transpose(0, 2, 1, 3).astype(bf16)
    kh = k.reshape(B, S, num_heads, dh).transpose(0, 2, 1, 3).astype(bf16)
    vh = v.reshape(B, S, num_heads, dh).transpose(0, 2, 1, 3).astype(bf16)
    s = jnp.einsum("bhqd,bhkd->bhqk", qh, kh, preferred_element_type=f32)
    p = jax.nn.softmax(s, axis=-1)
    ctx = jnp.einsum("bhqk,bhkd->bhqd", p.astype(bf16), vh, preferred_element_type=f32)
    attn = ctx.transpose(0, 2, 1, 3).reshape(B, S, D)
    attn = mm(attn, params["wo"]) + params["bo"]
    y = ln(x + attn)
    h1 = jnp.maximum(mm(y, params["w1"]) + params["b1"], 0.0)
    ffn = mm(h1, params["w2"]) + params["b2"]
    return ln(y + ffn)


if __name__ == "__main__":
    B, S, D = 2, 8, 32
    NUM_HEADS = 4
    D_FF = 64

    key = jax.random.PRNGKey(0)
    keys = jax.random.split(key, 16)

    def init(k, shape, scale=0.05):
        return jax.random.normal(k, shape, dtype=jnp.float32) * scale

    params = {
        "wq": init(keys[0], (D, D)), "bq": init(keys[1], (1, D)),
        "wk": init(keys[2], (D, D)), "bk": init(keys[3], (1, D)),
        "wv": init(keys[4], (D, D)), "bv": init(keys[5], (1, D)),
        "wo": init(keys[6], (D, D)), "bo": init(keys[7], (1, D)),
        "ln_g": jnp.ones((1, D), jnp.float32),
        "ln_b": jnp.zeros((1, D), jnp.float32),
        "w1": init(keys[8], (D, D_FF)), "b1": init(keys[9], (1, D_FF)),
        "w2": init(keys[10], (D_FF, D)), "b2": init(keys[11], (1, D)),
    }

    x = jax.random.normal(keys[12], (B, S, D), dtype=jnp.float32)

    out = transformer_encoder_unit(x, params, num_heads=NUM_HEADS)
    out = jax.block_until_ready(out)

    ref = reference_forward(x, params, num_heads=NUM_HEADS)
    assert out.shape == (B, S, D)
    # bf16 matmul operands + approx softmax reciprocal -> slightly relaxed tolerance.
    assert jnp.allclose(out, ref, atol=5e-3, rtol=5e-3), "mismatch vs JAX reference"

    print("KERNEL_OK")
</pallas_src>

<mosaic_0001>
module attributes {stable_mosaic.version = 11 : i64} {
  func.func @encoder_unit_kernel(%arg0: i32, %arg1: i32, %arg2: i32, %arg3: memref<1x8x32xf32, #tpu.memory_space<vmem>>, %arg4: memref<32x32xbf16, #tpu.memory_space<vmem>>, %arg5: memref<1x32xf32, #tpu.memory_space<vmem>>, %arg6: memref<32x32xbf16, #tpu.memory_space<vmem>>, %arg7: memref<1x32xf32, #tpu.memory_space<vmem>>, %arg8: memref<32x32xbf16, #tpu.memory_space<vmem>>, %arg9: memref<1x32xf32, #tpu.memory_space<vmem>>, %arg10: memref<32x32xbf16, #tpu.memory_space<vmem>>, %arg11: memref<1x32xf32, #tpu.memory_space<vmem>>, %arg12: memref<1x32xf32, #tpu.memory_space<vmem>>, %arg13: memref<1x32xf32, #tpu.memory_space<vmem>>, %arg14: memref<32x64xbf16, #tpu.memory_space<vmem>>, %arg15: memref<1x64xf32, #tpu.memory_space<vmem>>, %arg16: memref<64x32xbf16, #tpu.memory_space<vmem>>, %arg17: memref<1x32xf32, #tpu.memory_space<vmem>>, %arg18: memref<1x8x32xf32, #tpu.memory_space<vmem>>, %arg19: memref<4x8x8xbf16, #tpu.memory_space<vmem>>, %arg20: memref<4x8x8xbf16, #tpu.memory_space<vmem>>, %arg21: memref<8x32xf32, #tpu.memory_space<vmem>>, %arg22: memref<8x32xbf16, #tpu.memory_space<vmem>>, %arg23: memref<8x32xf32, #tpu.memory_space<vmem>>) attributes {dimension_semantics = [#tpu.dimension_semantics<parallel>, #tpu.dimension_semantics<arbitrary>, #tpu.dimension_semantics<arbitrary>], iteration_bounds = array<i64: 2, 1, 1>, scalar_prefetch = 0 : i64, scratch_operands = 5 : i64, tpu.core_type = #tpu.core_type<tc>, window_params = [{transform_indices = @transform_0, window_bounds = array<i64: 1, 8, 32>}, {pipeline_mode = #tpu.pipeline_mode<synchronous>, transform_indices = @transform_1, window_bounds = array<i64: 32, 32>}, {pipeline_mode = #tpu.pipeline_mode<synchronous>, transform_indices = @transform_2, window_bounds = array<i64: 1, 32>}, {pipeline_mode = #tpu.pipeline_mode<synchronous>, transform_indices = @transform_3, window_bounds = array<i64: 32, 32>}, {pipeline_mode = #tpu.pipeline_mode<synchronous>, transform_indices = @transform_4, window_bounds = array<i64: 1, 32>}, {pipeline_mode = #tpu.pipeline_mode<synchronous>, transform_indices = @transform_5, window_bounds = array<i64: 32, 32>}, {pipeline_mode = #tpu.pipeline_mode<synchronous>, transform_indices = @transform_6, window_bounds = array<i64: 1, 32>}, {pipeline_mode = #tpu.pipeline_mode<synchronous>, transform_indices = @transform_7, window_bounds = array<i64: 32, 32>}, {pipeline_mode = #tpu.pipeline_mode<synchronous>, transform_indices = @transform_8, window_bounds = array<i64: 1, 32>}, {pipeline_mode = #tpu.pipeline_mode<synchronous>, transform_indices = @transform_9, window_bounds = array<i64: 1, 32>}, {pipeline_mode = #tpu.pipeline_mode<synchronous>, transform_indices = @transform_10, window_bounds = array<i64: 1, 32>}, {transform_indices = @transform_11, window_bounds = array<i64: 32, 64>}, {transform_indices = @transform_12, window_bounds = array<i64: 1, 64>}, {transform_indices = @transform_13, window_bounds = array<i64: 64, 32>}, {pipeline_mode = #tpu.pipeline_mode<synchronous>, transform_indices = @transform_14, window_bounds = array<i64: 1, 32>}, {transform_indices = @transform_15, window_bounds = array<i64: 1, 8, 32>}]} {
    %c0_i32 = arith.constant 0 : i32
    %0 = arith.cmpi eq, %arg2, %c0_i32 : i32
    %1 = arith.extui %0 : i1 to i32
    %c0_i32_0 = arith.constant 0 : i32
    %2 = arith.cmpi ne, %1, %c0_i32_0 : i32
    scf.if %2 {
      %c0_i32_16 = arith.constant 0 : i32
      %20 = arith.cmpi eq, %arg1, %c0_i32_16 : i32
      %21 = arith.extui %20 : i1 to i32
      %c0_i32_17 = arith.constant 0 : i32
      %22 = arith.cmpi ne, %21, %c0_i32_17 : i32
      scf.if %22 {
        %c0_57 = arith.constant 0 : index
        %c0_58 = arith.constant 0 : index
        %c0_59 = arith.constant 0 : index
        %90 = vector.load %arg3[%c0_57, %c0_58, %c0_59] : memref<1x8x32xf32, #tpu.memory_space<vmem>>, vector<1x8x32xf32>
        %91 = vector.shape_cast %90 : vector<1x8x32xf32> to vector<8x32xf32>
        %92 = arith.truncf %91 : vector<8x32xf32> to vector<8x32xbf16>
        %c0_60 = arith.constant 0 : index
        %c0_61 = arith.constant 0 : index
        %93 = vector.load %arg6[%c0_60, %c0_61] : memref<32x32xbf16, #tpu.memory_space<vmem>>, vector<32x32xbf16>
        %cst_62 = arith.constant dense<0.000000e+00> : vector<8x32xf32>
        %94 = tpu.matmul %92, %93, %cst_62 {dimension_numbers = #tpu.dot_dimension_numbers<[1], [0], [0], [1], [0, 0, 1, 1], [], []>} : vector<8x32xbf16>, vector<32x32xbf16>, vector<8x32xf32> -> vector<8x32xf32>
        %c0_63 = arith.constant 0 : index
        %c0_64 = arith.constant 0 : index
        %95 = vector.load %arg7[%c0_63, %c0_64] : memref<1x32xf32, #tpu.memory_space<vmem>>, vector<1x32xf32>
        %96 = vector.broadcast %95 : vector<1x32xf32> to vector<8x32xf32>
        %97 = arith.addf %94, %96 : vector<8x32xf32>
        %c0_65 = arith.constant 0 : index
        %c0_66 = arith.constant 0 : index
        %98 = vector.load %arg8[%c0_65, %c0_66] : memref<32x32xbf16, #tpu.memory_space<vmem>>, vector<32x32xbf16>
        %cst_67 = arith.constant dense<0.000000e+00> : vector<8x32xf32>
        %99 = tpu.matmul %92, %98, %cst_67 {dimension_numbers = #tpu.dot_dimension_numbers<[1], [0], [0], [1], [0, 0, 1, 1], [], []>} : vector<8x32xbf16>, vector<32x32xbf16>, vector<8x32xf32> -> vector<8x32xf32>
        %c0_68 = arith.constant 0 : index
        %c0_69 = arith.constant 0 : index
        %100 = vector.load %arg9[%c0_68, %c0_69] : memref<1x32xf32, #tpu.memory_space<vmem>>, vector<1x32xf32>
        %101 = vector.broadcast %100 : vector<1x32xf32> to vector<8x32xf32>
        %102 = arith.addf %99, %101 : vector<8x32xf32>
        %103 = arith.truncf %97 : vector<8x32xf32> to vector<8x32xbf16>
        %104 = vector.shape_cast %103 : vector<8x32xbf16> to vector<8x4x8xbf16>
        %105 = tpu.transpose %104, [1, 0, 2] : vector<8x4x8xbf16> -> vector<4x8x8xbf16>
        %c0_70 = arith.constant 0 : index
        %c0_71 = arith.constant 0 : index
        %c0_72 = arith.constant 0 : index
        %106 = vector.load %arg19[%c0_70, %c0_71, %c0_72] : memref<4x8x8xbf16, #tpu.memory_space<vmem>>, vector<4x8x8xbf16>
        tpu.vector_store %arg19[%c0_70, %c0_71, %c0_72], %105 {strides = array<i32>} : memref<4x8x8xbf16, #tpu.memory_space<vmem>>, vector<4x8x8xbf16>,
        %107 = arith.truncf %102 : vector<8x32xf32> to vector<8x32xbf16>
        %108 = vector.shape_cast %107 : vector<8x32xbf16> to vector<8x4x8xbf16>
        %109 = tpu.transpose %108, [1, 0, 2] : vector<8x4x8xbf16> -> vector<4x8x8xbf16>
        %c0_73 = arith.constant 0 : index
        %c0_74 = arith.constant 0 : index
        %c0_75 = arith.constant 0 : index
        %110 = vector.load %arg20[%c0_73, %c0_74, %c0_75] : memref<4x8x8xbf16, #tpu.memory_space<vmem>>, vector<4x8x8xbf16>
        tpu.vector_store %arg20[%c0_73, %c0_74, %c0_75], %109 {strides = array<i32>} : memref<4x8x8xbf16, #tpu.memory_space<vmem>>, vector<4x8x8xbf16>,
      } else {
      }
      %c8_i32 = arith.constant 8 : i32
      %23 = arith.muli %arg1, %c8_i32 : i32
      %24 = tpu.assume_multiple %23, 8 : i32
      %c0_18 = arith.constant 0 : index
      %25 = arith.index_cast %24 : i32 to index
      %c0_19 = arith.constant 0 : index
      %26 = vector.load %arg3[%c0_18, %25, %c0_19] : memref<1x8x32xf32, #tpu.memory_space<vmem>>, vector<1x8x32xf32>
      %27 = vector.shape_cast %26 : vector<1x8x32xf32> to vector<8x32xf32>
      %28 = arith.truncf %27 : vector<8x32xf32> to vector<8x32xbf16>
      %c0_20 = arith.constant 0 : index
      %c0_21 = arith.constant 0 : index
      %29 = vector.load %arg4[%c0_20, %c0_21] : memref<32x32xbf16, #tpu.memory_space<vmem>>, vector<32x32xbf16>
      %cst_22 = arith.constant dense<0.000000e+00> : vector<8x32xf32>
      %30 = tpu.matmul %28, %29, %cst_22 {dimension_numbers = #tpu.dot_dimension_numbers<[1], [0], [0], [1], [0, 0, 1, 1], [], []>} : vector<8x32xbf16>, vector<32x32xbf16>, vector<8x32xf32> -> vector<8x32xf32>
      %c0_23 = arith.constant 0 : index
      %c0_24 = arith.constant 0 : index
      %31 = vector.load %arg5[%c0_23, %c0_24] : memref<1x32xf32, #tpu.memory_space<vmem>>, vector<1x32xf32>
      %32 = vector.broadcast %31 : vector<1x32xf32> to vector<8x32xf32>
      %33 = arith.addf %30, %32 : vector<8x32xf32>
      %cst_25 = arith.constant 0.353553385 : f32
      %34 = vector.broadcast %cst_25 : f32 to vector<8x32xf32>
      %35 = arith.mulf %33, %34 : vector<8x32xf32>
      %36 = arith.truncf %35 : vector<8x32xf32> to vector<8x32xbf16>
      %37 = vector.shape_cast %36 : vector<8x32xbf16> to vector<8x4x8xbf16>
      %38 = tpu.transpose %37, [1, 0, 2] : vector<8x4x8xbf16> -> vector<4x8x8xbf16>
      %c0_26 = arith.constant 0 : index
      %c0_27 = arith.constant 0 : index
      %c0_28 = arith.constant 0 : index
      %39 = vector.load %arg19[%c0_26, %c0_27, %c0_28] : memref<4x8x8xbf16, #tpu.memory_space<vmem>>, vector<4x8x8xbf16>
      "tpu.trace_start"() <{level = 10 : i32, message = "hqe,hke->hqk"}> : () -> ()
      %cst_29 = arith.constant dense<0.000000e+00> : vector<4x8x8xf32>
      %40 = tpu.matmul %38, %39, %cst_29 {dimension_numbers = #tpu.dot_dimension_numbers<[2], [2], [1], [1], [0, 0, 0, 1, 1, 1], [0], [0]>} : vector<4x8x8xbf16>, vector<4x8x8xbf16>, vector<4x8x8xf32> -> vector<4x8x8xf32>
      "tpu.trace_stop"() : () -> ()
      %cst_30 = arith.constant dense<0xFF800000> : vector<4x8xf32>
      %41 = vector.multi_reduction <maximumf>, %40, %cst_30 [2] : vector<4x8x8xf32> to vector<4x8xf32>
      %42 = vector.shape_cast %41 : vector<4x8xf32> to vector<4x8x1xf32>
      %43 = vector.broadcast %42 : vector<4x8x1xf32> to vector<4x8x8xf32>
      %44 = arith.subf %40, %43 : vector<4x8x8xf32>
      %45 = math.exp %44 : vector<4x8x8xf32>
      %cst_31 = arith.constant dense<0.000000e+00> : vector<4x8xf32>
      %46 = vector.multi_reduction <add>, %45, %cst_31 [2] : vector<4x8x8xf32> to vector<4x8xf32>
      %47 = vector.shape_cast %46 : vector<4x8xf32> to vector<4x8x1xf32>
      %48 = tpu.reciprocal %47 {approx = true} : vector<4x8x1xf32> -> vector<4x8x1xf32>
      %49 = vector.broadcast %48 : vector<4x8x1xf32> to vector<4x8x8xf32>
      %50 = arith.mulf %45, %49 : vector<4x8x8xf32>
      %51 = arith.truncf %50 : vector<4x8x8xf32> to vector<4x8x8xbf16>
      %c0_32 = arith.constant 0 : index
      %c0_33 = arith.constant 0 : index
      %c0_34 = arith.constant 0 : index
      %52 = vector.load %arg20[%c0_32, %c0_33, %c0_34] : memref<4x8x8xbf16, #tpu.memory_space<vmem>>, vector<4x8x8xbf16>
      "tpu.trace_start"() <{level = 10 : i32, message = "hqk,hke->hqe"}> : () -> ()
      %cst_35 = arith.constant dense<0.000000e+00> : vector<4x8x8xf32>
      %53 = tpu.matmul %51, %52, %cst_35 {dimension_numbers = #tpu.dot_dimension_numbers<[2], [1], [1], [2], [0, 0, 0, 1, 1, 2], [0], [0]>} : vector<4x8x8xbf16>, vector<4x8x8xbf16>, vector<4x8x8xf32> -> vector<4x8x8xf32>
      "tpu.trace_stop"() : () -> ()
      %54 = tpu.transpose %53, [1, 0, 2] : vector<4x8x8xf32> -> vector<8x4x8xf32>
      %55 = vector.shape_cast %54 : vector<8x4x8xf32> to vector<8x32xf32>
      %56 = arith.truncf %55 : vector<8x32xf32> to vector<8x32xbf16>
      %c0_36 = arith.constant 0 : index
      %c0_37 = arith.constant 0 : index
      %57 = vector.load %arg10[%c0_36, %c0_37] : memref<32x32xbf16, #tpu.memory_space<vmem>>, vector<32x32xbf16>
      %cst_38 = arith.constant dense<0.000000e+00> : vector<8x32xf32>
      %58 = tpu.matmul %56, %57, %cst_38 {dimension_numbers = #tpu.dot_dimension_numbers<[1], [0], [0], [1], [0, 0, 1, 1], [], []>} : vector<8x32xbf16>, vector<32x32xbf16>, vector<8x32xf32> -> vector<8x32xf32>
      %c0_39 = arith.constant 0 : index
      %c0_40 = arith.constant 0 : index
      %59 = vector.load %arg11[%c0_39, %c0_40] : memref<1x32xf32, #tpu.memory_space<vmem>>, vector<1x32xf32>
      %60 = vector.broadcast %59 : vector<1x32xf32> to vector<8x32xf32>
      %61 = arith.addf %58, %60 : vector<8x32xf32>
      %62 = arith.addf %27, %61 : vector<8x32xf32>
      %c0_41 = arith.constant 0 : index
      %c0_42 = arith.constant 0 : index
      %63 = vector.load %arg12[%c0_41, %c0_42] : memref<1x32xf32, #tpu.memory_space<vmem>>, vector<1x32xf32>
      %c0_43 = arith.constant 0 : index
      %c0_44 = arith.constant 0 : index
      %64 = vector.load %arg13[%c0_43, %c0_44] : memref<1x32xf32, #tpu.memory_space<vmem>>, vector<1x32xf32>
      %cst_45 = arith.constant dense<0.000000e+00> : vector<8xf32>
      %65 = vector.multi_reduction <add>, %62, %cst_45 [1] : vector<8x32xf32> to vector<8xf32>
      %66 = vector.shape_cast %65 : vector<8xf32> to vector<8x1xf32>
      %cst_46 = arith.constant 3.200000e+01 : f32
      %67 = vector.broadcast %cst_46 : f32 to vector<8x1xf32>
      %68 = arith.divf %66, %67 : vector<8x1xf32>
      %69 = vector.broadcast %68 : vector<8x1xf32> to vector<8x32xf32>
      %70 = arith.subf %62, %69 : vector<8x32xf32>
      %71 = arith.mulf %70, %70 : vector<8x32xf32>
      %cst_47 = arith.constant dense<0.000000e+00> : vector<8xf32>
      %72 = vector.multi_reduction <add>, %71, %cst_47 [1] : vector<8x32xf32> to vector<8xf32>
      %73 = vector.shape_cast %72 : vector<8xf32> to vector<8x1xf32>
      %cst_48 = arith.constant 3.200000e+01 : f32
      %74 = vector.broadcast %cst_48 : f32 to vector<8x1xf32>
      %75 = arith.divf %73, %74 : vector<8x1xf32>
      %cst_49 = arith.constant 9.99999974E-6 : f32
      %76 = vector.broadcast %cst_49 : f32 to vector<8x1xf32>
      %77 = arith.addf %75, %76 : vector<8x1xf32>
      %78 = math.rsqrt %77 : vector<8x1xf32>
      %79 = vector.broadcast %78 : vector<8x1xf32> to vector<8x32xf32>
      %80 = arith.mulf %70, %79 : vector<8x32xf32>
      %81 = vector.broadcast %63 : vector<1x32xf32> to vector<8x32xf32>
      %82 = arith.mulf %80, %81 : vector<8x32xf32>
      %83 = vector.broadcast %64 : vector<1x32xf32> to vector<8x32xf32>
      %84 = arith.addf %82, %83 : vector<8x32xf32>
      %c0_50 = arith.constant 0 : index
      %c0_51 = arith.constant 0 : index
      %85 = vector.load %arg21[%c0_50, %c0_51] : memref<8x32xf32, #tpu.memory_space<vmem>>, vector<8x32xf32>
      tpu.vector_store %arg21[%c0_50, %c0_51], %84 {strides = array<i32>} : memref<8x32xf32, #tpu.memory_space<vmem>>, vector<8x32xf32>,
      %86 = arith.truncf %84 : vector<8x32xf32> to vector<8x32xbf16>
      %c0_52 = arith.constant 0 : index
      %c0_53 = arith.constant 0 : index
      %87 = vector.load %arg22[%c0_52, %c0_53] : memref<8x32xbf16, #tpu.memory_space<vmem>>, vector<8x32xbf16>
      tpu.vector_store %arg22[%c0_52, %c0_53], %86 {strides = array<i32>} : memref<8x32xbf16, #tpu.memory_space<vmem>>, vector<8x32xbf16>,
      %cst_54 = arith.constant 0.000000e+00 : f32
      %88 = vector.broadcast %cst_54 : f32 to vector<8x32xf32>
      %c0_55 = arith.constant 0 : index
      %c0_56 = arith.constant 0 : index
      %89 = vector.load %arg23[%c0_55, %c0_56] : memref<8x32xf32, #tpu.memory_space<vmem>>, vector<8x32xf32>
      tpu.vector_store %arg23[%c0_55, %c0_56], %88 {strides = array<i32>} : memref<8x32xf32, #tpu.memory_space<vmem>>, vector<8x32xf32>,
    } else {
    }
    %c0 = arith.constant 0 : index
    %c0_1 = arith.constant 0 : index
    %3 = vector.load %arg22[%c0, %c0_1] : memref<8x32xbf16, #tpu.memory_space<vmem>>, vector<8x32xbf16>
    %c0_2 = arith.constant 0 : index
    %c0_3 = arith.constant 0 : index
    %4 = vector.load %arg14[%c0_2, %c0_3] : memref<32x64xbf16, #tpu.memory_space<vmem>>, vector<32x64xbf16>
    %cst = arith.constant dense<0.000000e+00> : vector<8x64xf32>
    %5 = tpu.matmul %3, %4, %cst {dimension_numbers = #tpu.dot_dimension_numbers<[1], [0], [0], [1], [0, 0, 1, 1], [], []>} : vector<8x32xbf16>, vector<32x64xbf16>, vector<8x64xf32> -> vector<8x64xf32>
    %c0_4 = arith.constant 0 : index
    %c0_5 = arith.constant 0 : index
    %6 = vector.load %arg15[%c0_4, %c0_5] : memref<1x64xf32, #tpu.memory_space<vmem>>, vector<1x64xf32>
    %7 = vector.broadcast %6 : vector<1x64xf32> to vector<8x64xf32>
    %8 = arith.addf %5, %7 : vector<8x64xf32>
    %cst_6 = arith.constant 0.000000e+00 : f32
    %9 = vector.broadcast %cst_6 : f32 to vector<8x64xf32>
    %10 = arith.maximumf %8, %9 : vector<8x64xf32>
    %c0_7 = arith.constant 0 : index
    %c0_8 = arith.constant 0 : index
    %11 = vector.load %arg23[%c0_7, %c0_8] : memref<8x32xf32, #tpu.memory_space<vmem>>, vector<8x32xf32>
    %12 = arith.truncf %10 : vector<8x64xf32> to vector<8x64xbf16>
    %c0_9 = arith.constant 0 : index
    %c0_10 = arith.constant 0 : index
    %13 = vector.load %arg16[%c0_9, %c0_10] : memref<64x32xbf16, #tpu.memory_space<vmem>>, vector<64x32xbf16>
    %cst_11 = arith.constant dense<0.000000e+00> : vector<8x32xf32>
    %14 = tpu.matmul %12, %13, %cst_11 {dimension_numbers = #tpu.dot_dimension_numbers<[1], [0], [0], [1], [0, 0, 1, 1], [], []>} : vector<8x64xbf16>, vector<64x32xbf16>, vector<8x32xf32> -> vector<8x32xf32>
    %15 = arith.addf %11, %14 : vector<8x32xf32>
    %c0_12 = arith.constant 0 : index
    %c0_13 = arith.constant 0 : index
    %16 = vector.load %arg23[%c0_12, %c0_13] : memref<8x32xf32, #tpu.memory_space<vmem>>, vector<8x32xf32>
    tpu.vector_store %arg23[%c0_12, %c0_13], %15 {strides = array<i32>} : memref<8x32xf32, #tpu.memory_space<vmem>>, vector<8x32xf32>,
    %c0_i32_14 = arith.constant 0 : i32
    %17 = arith.cmpi eq, %arg2, %c0_i32_14 : i32
    %18 = arith.extui %17 : i1 to i32
    %c0_i32_15 = arith.constant 0 : i32
    %19 = arith.cmpi ne, %18, %c0_i32_15 : i32
    scf.if %19 {
      %c0_16 = arith.constant 0 : index
      %c0_17 = arith.constant 0 : index
      %20 = vector.load %arg21[%c0_16, %c0_17] : memref<8x32xf32, #tpu.memory_space<vmem>>, vector<8x32xf32>
      %c0_18 = arith.constant 0 : index
      %c0_19 = arith.constant 0 : index
      %21 = vector.load %arg23[%c0_18, %c0_19] : memref<8x32xf32, #tpu.memory_space<vmem>>, vector<8x32xf32>
      %22 = arith.addf %20, %21 : vector<8x32xf32>
      %c0_20 = arith.constant 0 : index
      %c0_21 = arith.constant 0 : index
      %23 = vector.load %arg17[%c0_20, %c0_21] : memref<1x32xf32, #tpu.memory_space<vmem>>, vector<1x32xf32>
      %24 = vector.broadcast %23 : vector<1x32xf32> to vector<8x32xf32>
      %25 = arith.addf %22, %24 : vector<8x32xf32>
      %c0_22 = arith.constant 0 : index
      %c0_23 = arith.constant 0 : index
      %26 = vector.load %arg12[%c0_22, %c0_23] : memref<1x32xf32, #tpu.memory_space<vmem>>, vector<1x32xf32>
      %c0_24 = arith.constant 0 : index
      %c0_25 = arith.constant 0 : index
      %27 = vector.load %arg13[%c0_24, %c0_25] : memref<1x32xf32, #tpu.memory_space<vmem>>, vector<1x32xf32>
      %cst_26 = arith.constant dense<0.000000e+00> : vector<8xf32>
      %28 = vector.multi_reduction <add>, %25, %cst_26 [1] : vector<8x32xf32> to vector<8xf32>
      %29 = vector.shape_cast %28 : vector<8xf32> to vector<8x1xf32>
      %cst_27 = arith.constant 3.200000e+01 : f32
      %30 = vector.broadcast %cst_27 : f32 to vector<8x1xf32>
      %31 = arith.divf %29, %30 : vector<8x1xf32>
      %32 = vector.broadcast %31 : vector<8x1xf32> to vector<8x32xf32>
      %33 = arith.subf %25, %32 : vector<8x32xf32>
      %34 = arith.mulf %33, %33 : vector<8x32xf32>
      %cst_28 = arith.constant dense<0.000000e+00> : vector<8xf32>
      %35 = vector.multi_reduction <add>, %34, %cst_28 [1] : vector<8x32xf32> to vector<8xf32>
      %36 = vector.shape_cast %35 : vector<8xf32> to vector<8x1xf32>
      %cst_29 = arith.constant 3.200000e+01 : f32
      %37 = vector.broadcast %cst_29 : f32 to vector<8x1xf32>
      %38 = arith.divf %36, %37 : vector<8x1xf32>
      %cst_30 = arith.constant 9.99999974E-6 : f32
      %39 = vector.broadcast %cst_30 : f32 to vector<8x1xf32>
      %40 = arith.addf %38, %39 : vector<8x1xf32>
      %41 = math.rsqrt %40 : vector<8x1xf32>
      %42 = vector.broadcast %41 : vector<8x1xf32> to vector<8x32xf32>
      %43 = arith.mulf %33, %42 : vector<8x32xf32>
      %44 = vector.broadcast %26 : vector<1x32xf32> to vector<8x32xf32>
      %45 = arith.mulf %43, %44 : vector<8x32xf32>
      %46 = vector.broadcast %27 : vector<1x32xf32> to vector<8x32xf32>
      %47 = arith.addf %45, %46 : vector<8x32xf32>
      %c0_31 = arith.constant 0 : index
      %c0_32 = arith.constant 0 : index
      %c0_33 = arith.constant 0 : index
      %48 = vector.load %arg18[%c0_31, %c0_32, %c0_33] : memref<1x8x32xf32, #tpu.memory_space<vmem>>, vector<1x8x32xf32>
      %49 = vector.shape_cast %48 : vector<1x8x32xf32> to vector<8x32xf32>
      %50 = vector.shape_cast %47 : vector<8x32xf32> to vector<1x8x32xf32>
      tpu.vector_store %arg18[%c0_31, %c0_32, %c0_33], %50 {strides = array<i32>} : memref<1x8x32xf32, #tpu.memory_space<vmem>>, vector<1x8x32xf32>,
    } else {
    }
    return
  }
  func.func @transform_0(%arg0: i32, %arg1: i32, %arg2: i32) -> (i32, i32, i32) {
    %c0_i32 = arith.constant 0 : i32
    %c0_i32_0 = arith.constant 0 : i32
    %c0_i32_1 = arith.constant 0 : i32
    return %arg0, %c0_i32, %c0_i32_0 : i32, i32, i32
  }
  func.func @transform_1(%arg0: i32, %arg1: i32, %arg2: i32) -> (i32, i32) {
    %c0_i32 = arith.constant 0 : i32
    %c0_i32_0 = arith.constant 0 : i32
    %c0_i32_1 = arith.constant 0 : i32
    return %c0_i32, %c0_i32_0 : i32, i32
  }
  func.func @transform_2(%arg0: i32, %arg1: i32, %arg2: i32) -> (i32, i32) {
    %c0_i32 = arith.constant 0 : i32
    %c0_i32_0 = arith.constant 0 : i32
    %c0_i32_1 = arith.constant 0 : i32
    return %c0_i32, %c0_i32_0 : i32, i32
  }
  func.func @transform_3(%arg0: i32, %arg1: i32, %arg2: i32) -> (i32, i32) {
    %c0_i32 = arith.constant 0 : i32
    %c0_i32_0 = arith.constant 0 : i32
    %c0_i32_1 = arith.constant 0 : i32
    return %c0_i32, %c0_i32_0 : i32, i32
  }
  func.func @transform_4(%arg0: i32, %arg1: i32, %arg2: i32) -> (i32, i32) {
    %c0_i32 = arith.constant 0 : i32
    %c0_i32_0 = arith.constant 0 : i32
    %c0_i32_1 = arith.constant 0 : i32
    return %c0_i32, %c0_i32_0 : i32, i32
  }
  func.func @transform_5(%arg0: i32, %arg1: i32, %arg2: i32) -> (i32, i32) {
    %c0_i32 = arith.constant 0 : i32
    %c0_i32_0 = arith.constant 0 : i32
    %c0_i32_1 = arith.constant 0 : i32
    return %c0_i32, %c0_i32_0 : i32, i32
  }
  func.func @transform_6(%arg0: i32, %arg1: i32, %arg2: i32) -> (i32, i32) {
    %c0_i32 = arith.constant 0 : i32
    %c0_i32_0 = arith.constant 0 : i32
    %c0_i32_1 = arith.constant 0 : i32
    return %c0_i32, %c0_i32_0 : i32, i32
  }
  func.func @transform_7(%arg0: i32, %arg1: i32, %arg2: i32) -> (i32, i32) {
    %c0_i32 = arith.constant 0 : i32
    %c0_i32_0 = arith.constant 0 : i32
    %c0_i32_1 = arith.constant 0 : i32
    return %c0_i32, %c0_i32_0 : i32, i32
  }
  func.func @transform_8(%arg0: i32, %arg1: i32, %arg2: i32) -> (i32, i32) {
    %c0_i32 = arith.constant 0 : i32
    %c0_i32_0 = arith.constant 0 : i32
    %c0_i32_1 = arith.constant 0 : i32
    return %c0_i32, %c0_i32_0 : i32, i32
  }
  func.func @transform_9(%arg0: i32, %arg1: i32, %arg2: i32) -> (i32, i32) {
    %c0_i32 = arith.constant 0 : i32
    %c0_i32_0 = arith.constant 0 : i32
    %c0_i32_1 = arith.constant 0 : i32
    return %c0_i32, %c0_i32_0 : i32, i32
  }
  func.func @transform_10(%arg0: i32, %arg1: i32, %arg2: i32) -> (i32, i32) {
    %c0_i32 = arith.constant 0 : i32
    %c0_i32_0 = arith.constant 0 : i32
    %c0_i32_1 = arith.constant 0 : i32
    return %c0_i32, %c0_i32_0 : i32, i32
  }
  func.func @transform_11(%arg0: i32, %arg1: i32, %arg2: i32) -> (i32, i32) {
    %c0_i32 = arith.constant 0 : i32
    %c0_i32_0 = arith.constant 0 : i32
    return %c0_i32, %arg2 : i32, i32
  }
  func.func @transform_12(%arg0: i32, %arg1: i32, %arg2: i32) -> (i32, i32) {
    %c0_i32 = arith.constant 0 : i32
    %c0_i32_0 = arith.constant 0 : i32
    return %c0_i32, %arg2 : i32, i32
  }
  func.func @transform_13(%arg0: i32, %arg1: i32, %arg2: i32) -> (i32, i32) {
    %c0_i32 = arith.constant 0 : i32
    %c0_i32_0 = arith.constant 0 : i32
    return %arg2, %c0_i32 : i32, i32
  }
  func.func @transform_14(%arg0: i32, %arg1: i32, %arg2: i32) -> (i32, i32) {
    %c0_i32 = arith.constant 0 : i32
    %c0_i32_0 = arith.constant 0 : i32
    %c0_i32_1 = arith.constant 0 : i32
    return %c0_i32, %c0_i32_0 : i32, i32
  }
  func.func @transform_15(%arg0: i32, %arg1: i32, %arg2: i32) -> (i32, i32, i32) {
    %c0_i32 = arith.constant 0 : i32
    %c0_i32_0 = arith.constant 0 : i32
    return %arg0, %arg1, %c0_i32 : i32, i32, i32
  }
}

</mosaic_0001>

<bundles_post_ra>
// kernel: tpu_custom_call.1
= control target key start
LH: loop header
LB: loop body
LE: loop exit
PB: predicated region body
PF: predicated region fallthrough
CT: control target
= control target key end

     0   :  { %s3614_s0 = inlined_call_operand.vmem [shape: f32[2,8,32], index: 0, kind: input, shape index: {}]   ;;  %s3615_s1 = inlined_call_operand.vmem [shape: bf16[32,32], index: 1, kind: input, shape index: {}]   ;;  %s3616_s2 = inlined_call_operand.vmem [shape: f32[1,32], index: 2, kind: input, shape index: {}]   ;;  %s3617_s3 = inlined_call_operand.vmem [shape: bf16[32,32], index: 3, kind: input, shape index: {}]   ;;  %s3618_s4 = inlined_call_operand.vmem [shape: f32[1,32], index: 4, kind: input, shape index: {}]   ;;  %s3619_s5 = inlined_call_operand.hbm [shape: bf16[32,32], index: 5, kind: input, shape index: {}]   ;;  %s3620_s6 = inlined_call_operand.hbm [shape: f32[1,32], index: 6, kind: input, shape index: {}]   ;;  %s3621_s7 = inlined_call_operand.hbm [shape: bf16[32,32], index: 7, kind: input, shape index: {}]   ;;  %s3622_s8 = inlined_call_operand.hbm [shape: f32[1,32], index: 8, kind: input, shape index: {}]   ;;  %s3623_s9 = inlined_call_operand.hbm [shape: f32[1,32], index: 9, kind: input, shape index: {}]   ;;  %s3624_s10 = inlined_call_operand.vmem [shape: f32[1,32], index: 10, kind: input, shape index: {}]   ;;  %s3625_s11 = inlined_call_operand.vmem [shape: bf16[32,64], index: 11, kind: input, shape index: {}]   ;;  %s3626_s12 = inlined_call_operand.vmem [shape: f32[1,64], index: 12, kind: input, shape index: {}]   ;;  %s3627_s13 = inlined_call_operand.vmem [shape: bf16[64,32], index: 13, kind: input, shape index: {}]   ;;  %s3628_s14 = inlined_call_operand.vmem [shape: f32[1,32], index: 14, kind: input, shape index: {}]   ;;  %s3629_s15 = inlined_call_operand.hbm [shape: f32[2,8,32], index: 15, kind: output, shape index: {}]  }
   0x1   :  { %3645 = sst [smem:[#allocation30_spill]] %s3620_s6 }
   0x2   :  { %3646 = sst [smem:[#allocation31_spill]] %s3622_s8 }
   0x3   :  { %3647 = sst [smem:[#allocation32_spill]] %s3628_s14 }
   0x4   :  { %3648 = sst [smem:[#allocation33_spill]] %s3629_s15 }
   0x5   :  { %20 = vsyncpa [#allocation8], 0 }
   0x6   :  { %21 = vsyncpa [#allocation11], 0 }
   0x7   :  { %22 = vsyncpa [#allocation14], 0 }
   0x8   :  { %23 = vsyncpa [#allocation9], 0 }
   0x9   :  { %25 = vsyncpa [#allocation9 + $0x1], 0  ;;  %s3108_s18 = smov 0   ;;  %s3110_s19 = smov 0  }
   0xa   :  { %s3112_s20 = smov 0   ;;  %s3114_s21 = smov 0  }
   0xb   :  { %s3116_s22 = smov 0   ;;  %s3118_s23 = smov 0  }
   0xc LB: > { %3649 = sst [smem:[#allocation21_spill]] %s2987_s18  ;;  %s2424_s24 = sadd.s32 4294967295, %s3007_s23   ;;  %s3007_s23 = sphi %s3118_s23, %s31_s23   ;;  %s3003_s22 = sphi %s3116_s22, %s3681_s22   ;;  %s2999_s21 = sphi %s3114_s21, %s3680_s21   ;;  %s2995_s20 = sphi %s3112_s20, %s3679_s20   ;;  %s2991_s19 = sphi %s3110_s19, %s3678_s19   ;;  %s2987_s18 = sphi %s3108_s18, %s3677_s18  }
   0xd   : > { %3650 = sst [smem:[#allocation22_spill]] %s2991_s19  ;;  %s2425_s25 = sadd.s32 4294967294, %s3007_s23  }
   0xe   : > { %3651 = sst [smem:[#allocation23_spill]] %s2995_s20  ;;  %s50_s26 = sadd.s32 1, %s3003_s22 }
   0xf   : > { %3652 = sst [smem:[#allocation24_spill]] %s3003_s22  ;;  %s394_s27 = sadd.s32 1, %s2995_s20 }
  0x10   : > { %3653 = sst [smem:[#allocation25_spill]] %s3007_s23  ;;  %p52_p0 = scmp.ge.s32.totalorder %s50_s26, 2 }
  0x11   : > { %p404_p1 = scmp.ne.s32.totalorder %s2995_s20, %s2991_s19  ;;  %p405_p2 = scmp.eq.s32.totalorder %s2424_s24, 1 }
  0x12   : > { %p410_p3 = scmp.ne.s32.totalorder %s2991_s19, %s2987_s18  ;;  %s3683_s26 = smov (%p52_p0, %s50_s26), 0 }
  0x13   : > { %3654 = sst [smem:[#allocation26_spill]] %s3683_s26  ;;  %p3148_p4 = por %p405_p2, %p404_p1 }
  0x14   : > { %p411_p5 = scmp.eq.s32.totalorder %s2425_s25, 1  ;;  %s389_s29 = ssub.s32 %s3003_s22, %s3683_s26 }
  0x15   : > { %s3655_s28 = scalar_select %p3148_p4, 1, 0 }
  0x16   : > { %p2426_p6 = scmp.ge.s32.totalorder %s3007_s23, 1  ;;  %p392_p7 = scmp.eq.s32.totalorder %s389_s29, 0 }
  0x17   : > { %3656 = sst [smem:[#allocation27_spill]] %s3655_s28  ;;  %p3155_p8 = por %p411_p5, %p410_p3 }
  0x18   : > { %p418_p9 = scmp.lt.s32.totalorder %s3007_s23, 3  ;;  %p3167_p11 = scmp.eq.s32.totalorder %s2424_s24, 0 }
  0x19   : > { %s3657_s30 = scalar_select %p3155_p8, 1, 0 }
  0x1a   : > { %s3161_s16 = scalar_select %p392_p7, %s2995_s20, %s394_s27  }
  0x1b   : > { %3658 = sst [smem:[#allocation28_spill]] %s3657_s30  ;;  %p3163_p10 = pnand %p2426_p6, %p418_p9 }
  0x1c   : > { %3659 = sst [smem:[#allocation29_spill]] %s3161_s16  ;;  %s3009_s25 = smov [#allocation10]  }
  0x1d   : > { %s3660_s17 = scalar_select %p3163_p10, 1, 0 }
  0x1e   : > { %s3661_s18 = scalar_select %p3167_p11, 1, 0 }
  0x1f   : > { %p2646_p12 = pneg %p3163_p10  ;;  %s456_s29 = sshll.u32 %s3009_s25, 4  ;;  %s457_s29 = int_to_ptr.vmem [resolvable:$true] %s456_s29 }
  0x20   : > { %s3010_s26 = smov [#allocation13]   ;;  %s3663_s6 = sld [smem:[#allocation30_spill]] }
  0x21   : > { %s480_s22 = sshll.u32 %s3010_s26, 4  ;;  %p3175_p13 = pnand %p3167_p11, %p2646_p12  ;;  %s3179_s22 = int_to_ptr.vmem [resolvable:$true] %s480_s22 }
  0x23   : > { %p3189_p1 = pneg %p3175_p13 }
  0x26   : > { %s2777_s20 = scalar_lea.hbm %s3663_s6, 16 }
  0x27   : > { %p2778_p0 = scmp.ne.s32.totalorder %s3663_s6, %s2777_s20  ;;  %p2784_p5 = scmp.lt.u32.totalorder %s2777_s20, %s3663_s6 }
  0x29   : > { %p2780_p2 = pnand %p3189_p1, %p2778_p0 }
  0x2b   : > { %p2781_p3 = pneg %p2780_p2 }
  0x2d   : > { %p2786_p6 = pnand %p2784_p5, %p2781_p3 }
  0x2f   : > { %2789 = shalt.err (!%p2786_p6)
}
  0x30   : > { %s2790_s16 = scalar_lea.vmem %s457_s29, 16  ;;  %s2797_s23 = scalar_lea.vmem %s457_s29, 32 }
  0x31   : > { %p2791_p7 = scmp.ne.s32.totalorder %s457_s29, %s2790_s16  ;;  %p2798_p8 = scmp.lt.s32.totalorder %s457_s29, %s457_s29 }
  0x32   : > { %p2799_p4 = scmp.lt.s32.totalorder %s2797_s23, %s2790_s16 }
  0x33   : > { %p2793_p9 = pnand %p2791_p7, %p3189_p1 }
  0x34   : > { %p2800_p11 = por %p2799_p4, %p2798_p8 }
  0x35   : > { %p2794_p12 = pneg %p2793_p9 }
  0x37   : > { %p2801_p10 = pnand %p2800_p11, %p2794_p12 }
  0x39   : > { %2804 = shalt.err (!%p2801_p10)
}
  0x3a   : > { %2652 = dma.hbm_to_vmem [thread:$0]  (!%p3175_p13), %s3663_s6, 16, %s457_s29, [#allocation11]  }
  0x3b   : > { %s3665_s8 = sld [smem:[#allocation31_spill]] }
  0x41   : > { %s2805_s26 = scalar_lea.hbm %s3665_s8, 16 }
  0x42   : > { %p2806_p0 = scmp.ne.s32.totalorder %s3665_s8, %s2805_s26  ;;  %p2812_p8 = scmp.lt.u32.totalorder %s2805_s26, %s3665_s8 }
  0x44   : > { %p2808_p2 = pnand %p2806_p0, %p3189_p1 }
  0x46   : > { %p2809_p4 = pneg %p2808_p2 }
  0x48   : > { %p2814_p10 = pnand %p2812_p8, %p2809_p4 }
  0x4a   : > { %2817 = shalt.err (!%p2814_p10)
}
  0x4b   : > { %s2818_s29 = scalar_lea.vmem %s3179_s22, 16  ;;  %s2825_s19 = scalar_lea.vmem %s3179_s22, 32 }
  0x4c   : > { %p2819_p11 = scmp.ne.s32.totalorder %s3179_s22, %s2818_s29  ;;  %p2826_p6 = scmp.lt.s32.totalorder %s3179_s22, %s3179_s22 }
  0x4d   : > { %p2827_p7 = scmp.lt.s32.totalorder %s2825_s19, %s2818_s29 }
  0x4e   : > { %p2821_p3 = pnand %p2819_p11, %p3189_p1 }
  0x4f   : > { %p2828_p9 = por %p2827_p7, %p2826_p6 }
  0x50   : > { %p2822_p5 = pneg %p2821_p3 }
  0x52   : > { %p2829_p12 = pnand %p2828_p9, %p2822_p5 }
  0x54   : > { %2832 = shalt.err (!%p2829_p12)
}
  0x55   : > { %2658 = dma.hbm_to_vmem [thread:$0]  (!%p3175_p13), %s3665_s8, 16, %s3179_s22, [#allocation14]  }
  0x56   : > { %s3011_s24 = smov [#allocation7]   ;;  %s2833_s16 = scalar_lea.hbm %s3619_s5, 256 }
  0x57   : > { %s442_s15 = sshll.u32 %s3011_s24, 4  ;;  %p2834_p0 = scmp.ne.s32.totalorder %s3619_s5, %s2833_s16  ;;  %s443_s15 = int_to_ptr.vmem [resolvable:$true] %s442_s15 }
  0x58   : > { %p2840_p8 = scmp.lt.u32.totalorder %s2833_s16, %s3619_s5 }
  0x59   : > { %p2836_p2 = pnand %p2834_p0, %p3189_p1 }
  0x5b   : > { %p2837_p4 = pneg %p2836_p2 }
  0x5d   : > { %p2842_p10 = pnand %p2840_p8, %p2837_p4 }
  0x5f   : > { %2845 = shalt.err (!%p2842_p10)
}
  0x60   : > { %s2846_s22 = scalar_lea.vmem %s443_s15, 256  ;;  %p2854_p6 = scmp.lt.s32.totalorder %s443_s15, %s443_s15 }
  0x61   : > { %p2847_p11 = scmp.ne.s32.totalorder %s443_s15, %s2846_s22  ;;  %p2855_p7 = scmp.lt.s32.totalorder %s2846_s22, %s2846_s22 }
  0x63   : > { %p2849_p3 = pnand %p2847_p11, %p3189_p1  ;;  %p2856_p9 = por %p2855_p7, %p2854_p6 }
  0x65   : > { %p2850_p5 = pneg %p2849_p3 }
  0x67   : > { %p2857_p12 = pnand %p2856_p9, %p2850_p5 }
  0x69   : > { %2860 = shalt.err (!%p2857_p12)
}
  0x6a   : > { %s3012_s28 = smov 64   ;;  %s3013_s30 = smov 4  }
  0x6b   : > { %2649 = dma.hbm_to_vmem [thread:$0]  (!%p3175_p13), %s3619_s5, 256, %s443_s15, [#allocation8], %s3012_s28, %s3012_s28, %s3013_s30  }
  0x6c   : > { %s3014_s20 = smov [#allocation12]   ;;  %s3015_s16 = smov [#allocation15]  }
  0x6d   : > { %s466_s26 = sshll.u32 %s3014_s20, 4  ;;  %s491_s23 = sshll.u32 %s3015_s16, 4  ;;  %s467_s26 = int_to_ptr.vmem [resolvable:$true] %s466_s26  ;;  %s3247_s23 = int_to_ptr.vmem [resolvable:$true] %s491_s23 }
  0x6e   : > { %s2861_s22 = scalar_lea.hbm %s3621_s7, 256 }
  0x6f   : > { %p2862_p0 = scmp.ne.s32.totalorder %s3621_s7, %s2861_s22  ;;  %p2868_p8 = scmp.lt.u32.totalorder %s2861_s22, %s3621_s7 }
  0x71   : > { %p2864_p2 = pnand %p2862_p0, %p3189_p1 }
  0x73   : > { %p2865_p4 = pneg %p2864_p2 }
  0x75   : > { %p2870_p10 = pnand %p2868_p8, %p2865_p4 }
  0x77   : > { %2873 = shalt.err (!%p2870_p10)
}
  0x78   : > { %s2874_s24 = scalar_lea.vmem %s467_s26, 256  ;;  %p2882_p6 = scmp.lt.s32.totalorder %s467_s26, %s467_s26 }
  0x79   : > { %p2875_p11 = scmp.ne.s32.totalorder %s467_s26, %s2874_s24  ;;  %p2883_p7 = scmp.lt.s32.totalorder %s2874_s24, %s2874_s24 }
  0x7b   : > { %p2877_p3 = pnand %p2875_p11, %p3189_p1  ;;  %p2884_p9 = por %p2883_p7, %p2882_p6 }
  0x7d   : > { %p2878_p5 = pneg %p2877_p3 }
  0x7f   : > { %p2885_p12 = pnand %p2884_p9, %p2878_p5 }
  0x81   : > { %2888 = shalt.err (!%p2885_p12)
}
  0x82   : > { %2655 = dma.hbm_to_vmem [thread:$0]  (!%p3175_p13), %s3621_s7, 256, %s467_s26, [#allocation11], %s3012_s28, %s3012_s28, %s3013_s30  }
  0x83   : > { %s2889_s29 = scalar_lea.hbm %s3623_s9, 16 }
  0x84   : > { %p2890_p0 = scmp.ne.s32.totalorder %s3623_s9, %s2889_s29  ;;  %p2896_p8 = scmp.lt.u32.totalorder %s2889_s29, %s3623_s9 }
  0x86   : > { %p2892_p2 = pnand %p2890_p0, %p3189_p1 }
  0x88   : > { %p2893_p4 = pneg %p2892_p2 }
  0x8a   : > { %p2898_p10 = pnand %p2896_p8, %p2893_p4 }
  0x8c   : > { %2901 = shalt.err (!%p2898_p10)
}
  0x8d   : > { %s2902_s28 = scalar_lea.vmem %s3247_s23, 16  ;;  %s2909_s30 = scalar_lea.vmem %s3247_s23, 32 }
  0x8e   : > { %p2903_p11 = scmp.ne.s32.totalorder %s3247_s23, %s2902_s28  ;;  %p2910_p6 = scmp.lt.s32.totalorder %s3247_s23, %s3247_s23 }
  0x8f   : > { %p2911_p7 = scmp.lt.s32.totalorder %s2909_s30, %s2902_s28 }
  0x90   : > { %p2905_p3 = pnand %p2903_p11, %p3189_p1 }
  0x91   : > { %p2912_p9 = por %p2911_p7, %p2910_p6 }
  0x92   : > { %p2906_p5 = pneg %p2905_p3 }
  0x94   : > { %p2913_p12 = pnand %p2912_p9, %p2906_p5 }
  0x96   : > { %2916 = shalt.err (!%p2913_p12)
}
  0x97   : > { %2661 = dma.hbm_to_vmem [thread:$0]  (!%p3175_p13), %s3623_s9, 16, %s3247_s23, [#allocation14]  }
  0x98   : > { %p3666_p0 = scmp.ne.s32.totalorder %s3660_s17, 0 }
  0x99   : > { %p3667_p1 = scmp.ne.s32.totalorder (!%p3666_p0), %s3661_s18, 0 }
  0x9a   : > { %539 = sbr.rel (%p3666_p0) target bundleno = 2752 (0xac0), region = 80 }
  0xa1   : > { %2970 = dma.done.wait (%p3667_p1), [#allocation8], 256  }
  0xa2   : > { %2972 = vsyncadd (%p3667_p1), [#allocation8], 4294967040 }
  0xa3   : > { %2974 = dma.done.wait (%p3667_p1), [#allocation11], 272  }
  0xa4   : > { %2976 = vsyncadd (%p3667_p1), [#allocation11], 4294967024 }
  0xa5   : > { %2978 = dma.done.wait (%p3667_p1), [#allocation14], 32  }
  0xa6   : > { %2980 = vsyncadd (%p3667_p1), [#allocation14], 4294967264  ;;  %p614_p13 = scmp.lt.s32.totalorder %s2999_s21, 1  ;;  %vm665_vm0 = vcmask 261120   ;;  %v3016_v0 = vmov 0.0   ;;  %vm3017_vm1 = vmmov 0   ;;  %v783_v26 = vlaneseq }
  0xa7   : > { %2524 = vmatprep.subr.bf16.mxu0 %v3016_v0  ;;  %2528 = vmatprep.mubr.msk.bf16.mxu0 %vm3017_vm1, %v3016_v0  ;;  %2049 = vst.msk [vmem:[#allocation6] sm:$0xff] %vm665_vm0, %v3016_v0  ;;  %v2743_v1 = vld [vmem:[%s3617_s3] sm:$0xff]   ;;  %v2744_v2 = vld [vmem:[%s3617_s3 + $0x8] sm:$0xff]   ;;  %s3018_s30 = smov 104   ;;  %s3019_s26 = smov 120   ;;  %v2747_v22 = vld [vmem:[#allocation7] sm:$0xff]  }
  0xa8   : > { %s615_s17 = scalar_select %p614_p13, %s2999_s21, 1  ;;  %2532 = vmatprep.subr.bf16.mxu1 %v3016_v0  ;;  %2536 = vmatprep.mubr.msk.bf16.mxu1 %vm3017_vm1, %v3016_v0  ;;  %v2745_v4 = vld [vmem:[%s3615_s1] sm:$0xff]   ;;  %v2746_v6 = vld [vmem:[%s3615_s1 + $0x8] sm:$0xff]   ;;  %v3021_v24 = vmov 1983009808   ;;  %v784_v30 = vshrl.u32 %v783_v26, 7 }
  0xa9   : > { %2525 = vmatpush3.bf16.msra.mxu0 %v2743_v1  ;;  %v2444_v7 = vld [vmem:[%s3618_s4] ss:$0 sm:$0xff]  ;;  %2533 = vmatpush3.bf16.msra.mxu1 %v2747_v22  ;;  %v781_v25 = vunpack.c.l.s4 %v3021_v24  ;;  %v3022_v27 = vmov 1934713408   ;;  %v3023_v45 = vmov 0   ;;  %vm945_vm2 = vcmask 60416  }
  0xaa   : > { %s2443_s18 = sshll.u32 %s615_s17, 3  ;;  %2526 = vmatprep.subr.bf16.mxu0 %v3016_v0  ;;  %v2452_v14 = vld [vmem:[%s3616_s2] ss:$0 sm:$0xff]  ;;  %2534 = vmatprep.subr.bf16.mxu1 %v3016_v0  ;;  %v798_v28 = vunpack.c.l.s4 %v3022_v27  ;;  %vm1372_vm3 = vcmask 64512   ;;  %vm1612_vm4 = vcmask 1043456   ;;  %s3024_s27 = smov 16  }
  0xab   : > { %s617_s23 = scalar_lea.vmem %s3614_s0, %s2443_s18  ;;  %s3020_s18 = smov 112   ;;  %v2748_v23 = vld [vmem:[#allocation7 + $0x8] sm:$0xff]   ;;  %v782_v29 = vunpack.c.0.s8 %v781_v25  ;;  %vm1943_vm5 = vcmask 130048   ;;  %vm1945_vm6 = vcmask 195584   ;;  %vm2047_vm7 = vcmask 257024  }
  0xac   : > { %v3324_v3 = vld [vmem:[%s617_s23] sm:$0xff]  ;;  %v799_v31 = vunpack.c.0.s8 %v798_v28  ;;  %s3025_s25 = smov 8   ;;  %s3026_s23 = smov 24   ;;  %vm2153_vm8 = vcmask 523264  }
  0xad   : > { %v641_v5 = vpack.c.bf16 %v3324_v3, %v3324_v3  ;;  %2527 = vmatpush3.bf16.msra.mxu0 %v2744_v2  ;;  %2535 = vmatpush3.bf16.msra.mxu1 %v2748_v23  ;;  %v3361_v32 = vsub.s32 %v782_v29, %v784_v30  ;;  %s3668_s8 = sld [smem:[#allocation32_spill]]  ;;  %s3669_s14 = sld [smem:[#allocation22_spill]] }
  0xae   : > { %2540 = vmatprep.subr.bf16.mxu0 %v3016_v0  ;;  %2548 = vmatprep.subr.bf16.mxu1 %v3016_v0  ;;  %v3364_v36 = vsub.s32 %v799_v31, %v784_v30  ;;  %s3670_s20 = sld [smem:[#allocation27_spill]]  ;;  %s2485_s19 = sshll.u32 %s2999_s21, 7 }
  0xaf   : > { %s3027_s21 = smov [#allocation16]  }
  0xb0   : > { %2529 = vmatmul.mubr.msk.bf16.vlgmr.msra.gmra.mrb[0].mxu0 %vm665_vm0, %v641_v5  ;;  %2537 = vmatmul.mubr.msk.bf16.vlgmr.msra.gmra.mrb[0].mxu1 %vm665_vm0, %v641_v5 }
  0xb1   : > { %2541 = vmatpush3.bf16.msra.mxu0 %v2745_v4  ;;  %2544 = vmatprep.mubr.msk.bf16.mxu0 %vm3017_vm1, %v3016_v0 }
  0xb2   : > { %2542 = vmatprep.subr.bf16.mxu0 %v3016_v0  ;;  %2550 = vmatprep.mubr.msk.bf16.mxu1 %vm3017_vm1, %v3016_v0 }
  0xb3   : > { %s611_s16 = sand.u32 1, %s3669_s14  }
  0xb4   : > { %s2442_s29 = sshll.u32 %s611_s16, 3  ;;  %s2245_s24 = scalar_lea.sflag [#allocation9], %s611_s16 }
  0xb5   : > { %2543 = vmatpush3.bf16.msra.mxu0 %v2746_v6  ;;  %s613_s22 = scalar_lea.vmem [#allocation16], %s2442_s29  ;;  %p3672_p4 = scmp.ne.s32.totalorder %s3670_s20, 0 }
  0xb6   : > { %2554 = vmatprep.subr.bf16.mxu0 %v3016_v0  ;;  %s2259_s6 = sshll.u32 %s613_s22, 4  ;;  %s3568_s6 = int_to_ptr.vmem [resolvable:$true] %s2259_s6 }
  0xb7   : > { %s2917_s17 = scalar_lea.vmem %s3568_s6, 128 }
  0xb8   : > { %2545 = vmatmul.mubr.msk.bf16.vlgmr.msra.gmra.mrb[4].mxu0 %vm665_vm0, %v641_v5  ;;  %p2918_p2 = scmp.ne.s32.totalorder %s3568_s6, %s2917_s17 }
  0xb9   : > { %2556 = vmatprep.mubr.msk.bf16.mxu0 %vm3017_vm1, %v3016_v0 }
  0xba   : > { %p2919_p8 = pnand %p2918_p2, %p3672_p4 }
  0xbc   : > { %p2920_p10 = pneg %p2919_p8 }
 0x183   : > { %v703_v8 = vpop.f32.mrb[0].mxu0 }
 0x184   : > { %v704_v9 = vadd.f32 %v2444_v7, %v703_v8  ;;  %v2530_v10 = vpop.f32.mrb[1].mxu0 }
 0x185   : > { %v706_v11 = vpop.f32.mrb[2].mxu0 }
 0x186   : > { %v772_v12 = vpack.c.bf16 %v704_v9, %v704_v9  ;;  %v2531_v13 = vpop.f32.mrb[3].mxu0 }
 0x188   : > { %778 = vrot.lane.b32.xlu1 %v772_v12, %s3018_s30  ;;  %774 = vrot.lane.b32.xlu0 %v772_v12, %s3019_s26  ;;  %v786_v44 = vrot.slane %v772_v12, %v3361_v32 }
 0x18b   : > { %v1192_v15 = vpop.f32.mrb[4].mxu0 }
 0x18c   : > { %v1193_v16 = vadd.f32 %v2452_v14, %v1192_v15  ;;  %776 = vrot.lane.b32.xlu0 %v772_v12, %s3020_s18  ;;  %v2546_v17 = vpop.f32.mrb[5].mxu0 }
 0x18d   : > { %v1195_v18 = vpop.f32.mrb[6].mxu0 }
 0x18e   : > { %v1198_v19 = vmul.f32 0.35355338, %v1193_v16  ;;  %v2547_v20 = vpop.f32.mrb[7].mxu0 }
 0x190   : > { %v1199_v21 = vpack.c.bf16 %v1198_v19, %v1198_v19 }
 0x192   : > { %1203 = vrot.lane.b32.xlu0 %v1199_v21, %s3020_s18  ;;  %1201 = vrot.lane.b32.xlu1 %v1199_v21, %s3019_s26  ;;  %v1213_v50 = vrot.slane %v1199_v21, %v3361_v32 }
 0x196   : > { %1205 = vrot.lane.b32.xlu1 %v1199_v21, %s3018_s30 }
 0x1fa   : > { %v779_v33 = vpop.permute.xlu1 %778  ;;  %v775_v34 = vpop.permute.xlu0 %774 }
 0x1fb   : > { %v828_v35 = vrot.slane %v779_v33, %v3361_v32  ;;  %v820_v37 = vrot.slane %v775_v34, %v3361_v32 }
 0x1fd   : > { %v829_v38 = vcombine.low %v820_v37, %v828_v35  ;;  %v830_v39 = vcombine.high %v820_v37, %v828_v35 }
 0x1fe   : > { %v777_v40 = vpop.permute.xlu0 %776 }
 0x1ff   : > { %v837_v41 = vrot.slane %v829_v38, %v3364_v36  ;;  %v844_v42 = vrot.slane %v830_v39, %v3364_v36  ;;  %v794_v43 = vrot.slane %v777_v40, %v3361_v32 }
 0x201   : > { %v845_v46 = vcombine.high %v837_v41, %v3023_v45  ;;  %v846_v47 = vcombine.high %v844_v42, %v3023_v45  ;;  %v795_v48 = vcombine.low %v786_v44, %v794_v43  ;;  %v796_v49 = vcombine.high %v786_v44, %v794_v43 }
 0x202   : > { %v852_v51 = vshrl.u32 %v837_v41, 16  ;;  %v868_v52 = vshrl.u32 %v844_v42, 16 }
 0x203   : > { %v803_v53 = vrot.slane %v795_v48, %v3364_v36  ;;  %v810_v54 = vrot.slane %v796_v49, %v3364_v36  ;;  %v860_v57 = vshrl.u32 %v845_v46, 16  ;;  %v876_v58 = vshrl.u32 %v846_v47, 16 }
 0x204   : > { %v1204_v55 = vpop.permute.xlu0 %1203  ;;  %v1202_v56 = vpop.permute.xlu1 %1201 }
 0x205   : > { %v1221_v59 = vrot.slane %v1204_v55, %v3361_v32  ;;  %v1247_v60 = vrot.slane %v1202_v56, %v3361_v32  ;;  %v811_v61 = vcombine.high %v803_v53, %v3023_v45  ;;  %v812_v62 = vcombine.high %v810_v54, %v3023_v45 }
 0x206   : > { %v849_v63 = vpack.i.b16 %v837_v41, %v803_v53  ;;  %v851_v1 = vshrl.u32 %v803_v53, 16  ;;  %v865_v2 = vpack.i.b16 %v844_v42, %v810_v54  ;;  %v867_v4 = vshrl.u32 %v810_v54, 16 }
 0x207   : > { %v1222_v5 = vcombine.low %v1213_v50, %v1221_v59  ;;  %v1223_v6 = vcombine.high %v1213_v50, %v1221_v59  ;;  %v857_v8 = vpack.i.b16 %v845_v46, %v811_v61  ;;  %v859_v9 = vshrl.u32 %v811_v61, 16 }
 0x208   : > { %v853_v7 = vpack.i.b16 %v852_v51, %v851_v1  ;;  %v873_v10 = vpack.i.b16 %v846_v47, %v812_v62  ;;  %v1206_v11 = vpop.permute.xlu1 %1205  ;;  %v869_v12 = vpack.i.b16 %v868_v52, %v867_v4  ;;  %v875_v13 = vshrl.u32 %v812_v62, 16 }
 0x209   : > { %v879_v14 = vcombine.low %v849_v63, %v865_v2  ;;  %v1230_v15 = vrot.slane %v1222_v5, %v3364_v36  ;;  %v861_v16 = vpack.i.b16 %v860_v57, %v859_v9  ;;  %v1237_v18 = vrot.slane %v1223_v6, %v3364_v36 }
 0x20a   : > { %v887_v17 = vcombine.low %v857_v8, %v873_v10  ;;  %v1255_v19 = vrot.slane %v1206_v11, %v3361_v32  ;;  %v877_v20 = vpack.i.b16 %v876_v58, %v875_v13  ;;  %v904_v21 = vcombine.low %v853_v7, %v869_v12 }
 0x20b   : > { %v886_v22 = vrot.slane %v879_v14, %v3361_v32  ;;  %v1238_v24 = vcombine.high %v1230_v15, %v3023_v45  ;;  %v1239_v26 = vcombine.high %v1237_v18, %v3023_v45  ;;  %v1278_v33 = vshrl.u32 %v1230_v15, 16 }
 0x20c   : > { %v894_v23 = vrot.slane %v887_v17, %v3361_v32  ;;  %v912_v25 = vcombine.low %v861_v16, %v877_v20  ;;  %v1256_v27 = vcombine.low %v1247_v60, %v1255_v19  ;;  %v1257_v29 = vcombine.high %v1247_v60, %v1255_v19 }
 0x20d   : > { %v911_v30 = vrot.slane %v904_v21, %v3361_v32  ;;  %v1286_v37 = vshrl.u32 %v1238_v24, 16  ;;  %v1294_v38 = vshrl.u32 %v1237_v18, 16  ;;  %v1302_v41 = vshrl.u32 %v1239_v26, 16 }
 0x20e   : > { %v895_v28 = vcombine.low %v886_v22, %v894_v23  ;;  %v919_v31 = vrot.slane %v912_v25, %v3361_v32  ;;  %v1264_v34 = vrot.slane %v1256_v27, %v3364_v36  ;;  %v1271_v39 = vrot.slane %v1257_v29, %v3364_v36 }
 0x210   : > { %v902_v35 = vrot.slane %v895_v28, %v3364_v36  ;;  %v920_v40 = vcombine.low %v911_v30, %v919_v31  ;;  %v1272_v42 = vcombine.high %v1264_v34, %v3023_v45  ;;  %v1279_v43 = vshrl.u32 %v1264_v34, 16 }
 0x211   : > { %v1273_v47 = vcombine.high %v1271_v39, %v3023_v45  ;;  %v1276_v48 = vpack.i.b16 %v1264_v34, %v1230_v15  ;;  %v1292_v52 = vpack.i.b16 %v1271_v39, %v1237_v18  ;;  %v1295_v54 = vshrl.u32 %v1271_v39, 16 }
 0x212   : > { %v903_v44 = vcombine.high %v902_v35, %v3023_v45  ;;  %v933_v46 = vshrl.u32 %v902_v35, 16  ;;  %v927_v49 = vrot.slane %v920_v40, %v3364_v36  ;;  %v1284_v50 = vpack.i.b16 %v1272_v42, %v1238_v24 }
 0x213   : > { %v1287_v51 = vshrl.u32 %v1272_v42, 16  ;;  %v1280_v53 = vpack.i.b16 %v1279_v43, %v1278_v33  ;;  %v1300_v55 = vpack.i.b16 %v1273_v47, %v1239_v26  ;;  %v1303_v56 = vshrl.u32 %v1273_v47, 16 }
 0x214   : > { %v928_v57 = vcombine.high %v927_v49, %v3023_v45  ;;  %v931_v58 = vpack.i.b16 %v927_v49, %v902_v35  ;;  %v934_v59 = vshrl.u32 %v927_v49, 16  ;;  %v941_v61 = vshrl.u32 %v903_v44, 16 }
 0x215   : > { %v1288_v60 = vpack.i.b16 %v1287_v51, %v1286_v37  ;;  %v1296_v62 = vpack.i.b16 %v1295_v54, %v1294_v38  ;;  %v1304_v63 = vpack.i.b16 %v1303_v56, %v1302_v41  ;;  %v1314_v1 = vcombine.low %v1284_v50, %v1300_v55  ;;  %v766_v38 = vpop.f32.mrb[0].mxu1 }
 0x216   : > { %v935_v2 = vpack.i.b16 %v934_v59, %v933_v46  ;;  %v939_v4 = vpack.i.b16 %v928_v57, %v903_v44  ;;  %v942_v5 = vshrl.u32 %v928_v57, 16  ;;  %946 = vst.msk [vmem:[#allocation2] sm:$0xf] %vm945_vm2, %v931_v58  ;;  %v1306_v6 = vcombine.low %v1276_v48, %v1292_v52  ;;  %v2538_v39 = vpop.f32.mrb[1].mxu1 }
 0x217   : > { %v1331_v7 = vcombine.low %v1280_v53, %v1296_v62  ;;  %v1339_v8 = vcombine.low %v1288_v60, %v1304_v63  ;;  %v1321_v10 = vrot.slane %v1314_v1, %v3361_v32  ;;  %v769_v40 = vpop.f32.mrb[2].mxu1  ;;  %v2448_v60 = vld [vmem:[#allocation10] ss:$0 sm:$0xff] }
 0x218   : > { %v943_v9 = vpack.i.b16 %v942_v5, %v941_v61  ;;  %947 = vst.msk [vmem:[#allocation2 + $0x4] sm:$0xf] %vm945_vm2, %v935_v2  ;;  %948 = vst.msk [vmem:[#allocation2 + $0x8] sm:$0xf] %vm945_vm2, %v939_v4  ;;  %v1313_v13 = vrot.slane %v1306_v6, %v3361_v32  ;;  %v2539_v41 = vpop.f32.mrb[3].mxu1  ;;  %v767_v1 = vadd.f32 %v2448_v60, %v766_v38 }
 0x219   : > { %v1338_v11 = vrot.slane %v1331_v7, %v3361_v32  ;;  %v1346_v12 = vrot.slane %v1339_v8, %v3361_v32 }
 0x21a   : > { %949 = vst.msk [vmem:[#allocation2 + $0xc] sm:$0xf] %vm945_vm2, %v943_v9  ;;  %v1322_v15 = vcombine.low %v1313_v13, %v1321_v10  ;;  %v950_v2 = vpack.c.bf16 %v767_v1, %v767_v1 }
 0x21b   : > { %v1347_v14 = vcombine.low %v1338_v11, %v1346_v12 }
 0x21c   : > { %v1329_v21 = vrot.slane %v1322_v15, %v3364_v36 }
 0x21d   : > { %v1368_v16 = vld [vmem:[#allocation2] sm:$0xf]  ;;  %v1354_v18 = vrot.slane %v1347_v14, %v3364_v36 }
 0x21e   : > { %v1377_v17 = vsel %vm1372_vm3, %v1368_v16, 0  ;;  %v1359_v25 = vshrl.u32 %v1329_v21, 16  ;;  %v1330_v31 = vcombine.high %v1329_v21, %v3023_v45 }
 0x21f   : > { %2549 = vmatpush3.bf16.xpose.msra.mxu1 %v1377_v17  ;;  %v1369_v19 = vld [vmem:[#allocation2 + $0x4] sm:$0xf]  ;;  %v1360_v22 = vshrl.u32 %v1354_v18, 16  ;;  %v1370_v23 = vld [vmem:[#allocation2 + $0x8] sm:$0xf]  ;;  %v1358_v24 = vpack.i.b16 %v1354_v18, %v1329_v21  ;;  %v1355_v29 = vcombine.high %v1354_v18, %v3023_v45 }
 0x220   : > { %v1423_v20 = vsel %vm1372_vm3, %v1369_v19, 0  ;;  %2560 = vmatprep.subr.bf16.mxu1 %v3016_v0  ;;  %v1469_v27 = vsel %vm1372_vm3, %v1370_v23, 0  ;;  %v1365_v35 = vshrl.u32 %v1330_v31, 16 }
 0x221   : > { %2555 = vmatpush3.bf16.xpose.msra.mxu0 %v1423_v20  ;;  %v1371_v26 = vld [vmem:[#allocation2 + $0xc] sm:$0xf]  ;;  %v1361_v28 = vpack.i.b16 %v1360_v22, %v1359_v25  ;;  %v1366_v33 = vshrl.u32 %v1355_v29, 16  ;;  %v1364_v34 = vpack.i.b16 %v1355_v29, %v1330_v31 }
 0x222   : > { %2566 = vmatprep.subr.bf16.mxu0 %v3016_v0  ;;  %v1515_v30 = vsel %vm1372_vm3, %v1371_v26, 0 }
 0x223   : > { %v1367_v37 = vpack.i.b16 %v1366_v33, %v1365_v35 }
 0x226   : > { %2551 = vmatmul.mubr.msk.bf16.vlgmr.msra.gmra.mrb[4].mxu1 %vm1372_vm3, %v1358_v24 }
 0x227   : > { %2561 = vmatpush3.bf16.xpose.msra.mxu1 %v1469_v27  ;;  %2562 = vmatprep.mubr.msk.bf16.mxu1 %vm3017_vm1, %v3016_v0  ;;  %v964_v27 = vrot.slane %v950_v2, %v3361_v32 }
 0x228   : > { %2557 = vmatmul.mubr.msk.bf16.vlgmr.msra.gmra.mrb[8].mxu0 %vm1372_vm3, %v1361_v28  ;;  %2572 = vmatprep.subr.bf16.mxu1 %v3016_v0 }
 0x229   : > { %2567 = vmatpush3.bf16.xpose.msra.mxu0 %v1515_v30  ;;  %2568 = vmatprep.mubr.msk.bf16.mxu0 %vm3017_vm1, %v3016_v0 }
 0x22a   : > { %2578 = vmatprep.subr.bf16.mxu0 %v3016_v0 }
 0x22e   : > { %2563 = vmatmul.mubr.msk.bf16.vlgmr.msra.gmra.mrb[8].mxu1 %vm1372_vm3, %v1364_v34 }
 0x22f   : > { %2574 = vmatprep.mubr.msk.bf16.mxu1 %vm3017_vm1, %v3016_v0 }
 0x230   : > { %2569 = vmatmul.mubr.msk.bf16.vlgmr.msra.gmra.mrb[12].mxu0 %vm1372_vm3, %v1367_v37 }
 0x231   : > { %2580 = vmatprep.mubr.msk.bf16.mxu0 %vm3017_vm1, %v3016_v0 }
 0x2f9   : > { %v1413_v42 = vpop.f32.mrb[4].mxu1 }
 0x2fa   : > { %v2552_v43 = vpop.f32.mrb[5].mxu1  ;;  %v1557_v44 = vsel %vm1372_vm3, %v1413_v42, -inf }
 0x2fb   : > { %1558 = vmax.xlane.f32.xlu0 %v1557_v44  ;;  %v1416_v46 = vpop.f32.mrb[6].mxu1  ;;  %v1459_v47 = vpop.f32.mrb[8].mxu0 }
 0x2fc   : > { %v2553_v48 = vpop.f32.mrb[7].mxu1  ;;  %v2558_v49 = vpop.f32.mrb[9].mxu0  ;;  %v1560_v50 = vsel %vm1372_vm3, %v1459_v47, -inf }
 0x2fd   : > { %1561 = vmax.xlane.f32.xlu1 %v1560_v50  ;;  %v1462_v51 = vpop.f32.mrb[10].mxu0 }
 0x2fe   : > { %v2559_v52 = vpop.f32.mrb[11].mxu0 }
 0x301   : > { %v1505_v53 = vpop.f32.mrb[8].mxu1 }
 0x302   : > { %v2564_v54 = vpop.f32.mrb[9].mxu1  ;;  %v1563_v55 = vsel %vm1372_vm3, %v1505_v53, -inf }
 0x303   : > { %1564 = vmax.xlane.f32.xlu0 %v1563_v55  ;;  %v1508_v56 = vpop.f32.mrb[10].mxu1  ;;  %v1551_v57 = vpop.f32.mrb[12].mxu0 }
 0x304   : > { %v2565_v58 = vpop.f32.mrb[11].mxu1  ;;  %v2570_v59 = vpop.f32.mrb[13].mxu0  ;;  %v1566_v63 = vsel %vm1372_vm3, %v1551_v57, -inf }
 0x305   : > { %v1554_v61 = vpop.f32.mrb[14].mxu0 }
 0x306   : > { %v2571_v62 = vpop.f32.mrb[15].mxu0 }
 0x307   : > { %1567 = vmax.xlane.f32.xlu0 %v1566_v63 }
 0x30e   : > { %952 = vrot.lane.b32.xlu1 %v950_v2, %s3019_s26 }
 0x312   : > { %956 = vrot.lane.b32.xlu1 %v950_v2, %s3018_s30  ;;  %s3671_s30 = sld [smem:[#allocation33_spill]] }
 0x318   : > { %s3566_s26 = scalar_lea.hbm %s3671_s30, %s2485_s19 }
 0x31d   : > { %954 = vrot.lane.b32.xlu0 %v950_v2, %s3020_s18  ;;  %s2921_s18 = sshll.u32 %s3027_s21, 4  ;;  %s2922_s18 = int_to_ptr.vmem [resolvable:$false] %s2921_s18 }
 0x31e   : > { %p2924_p11 = scmp.lt.s32.totalorder %s3568_s6, %s2922_s18 }
 0x388   : > { %v1559_v4 = vpop.xlane.xlu0 %1558 }
 0x389   : > { %v1569_v5 = vsub.f32 %v1413_v42, %v1559_v4 }
 0x38a   : > { %v1562_v6 = vpop.xlane.xlu1 %1561 }
 0x38b   : > { %v1573_v7 = vmul.f32 1.442695, %v1569_v5  ;;  %v1570_v8 = vsub.f32 %v1459_v47, %v1562_v6 }
 0x38d   : > { %2757 = vpow2.f32 %v1573_v7  ;;  %v1575_v9 = vmul.f32 1.442695, %v1570_v8 }
 0x38e   : > { %v953_v10 = vpop.permute.xlu1 %952 }
 0x38f   : > { %2759 = vpow2.f32 %v1575_v9  ;;  %v998_v14 = vrot.slane %v953_v10, %v3361_v32 }
 0x390   : > { %v1565_v11 = vpop.xlane.xlu0 %1564 }
 0x391   : > { %v1571_v12 = vsub.f32 %v1505_v53, %v1565_v11 }
 0x392   : > { %v957_v13 = vpop.permute.xlu1 %956 }
 0x393   : > { %v1577_v15 = vmul.f32 1.442695, %v1571_v12  ;;  %v1006_v16 = vrot.slane %v957_v13, %v3361_v32 }
 0x394   : > { %v1568_v17 = vpop.xlane.xlu0 %1567 }
 0x395   : > { %2761 = vpow2.f32 %v1577_v15  ;;  %v1007_v18 = vcombine.low %v998_v14, %v1006_v16  ;;  %v1572_v19 = vsub.f32 %v1551_v57, %v1568_v17  ;;  %v1008_v21 = vcombine.high %v998_v14, %v1006_v16 }
 0x397   : > { %v3438_v20 = vpop.eup %2757  ;;  %v1579_v22 = vmul.f32 1.442695, %v1572_v19  ;;  %v1015_v26 = vrot.slane %v1007_v18, %v3364_v36  ;;  %v1022_v30 = vrot.slane %v1008_v21, %v3364_v36 }
 0x398   : > { %v955_v23 = vpop.permute.xlu0 %954  ;;  %v1581_v24 = vsel %vm1372_vm3, %v3438_v20, 0.0 }
 0x399   : > { %v3442_v25 = vpop.eup %2759  ;;  %1582 = vadd.xlane.f32.xlu1 %v1581_v24  ;;  %2763 = vpow2.f32 %v1579_v22  ;;  %v972_v28 = vrot.slane %v955_v23, %v3361_v32  ;;  %v1023_v34 = vcombine.high %v1015_v26, %v3023_v45  ;;  %v1024_v39 = vcombine.high %v1022_v30, %v3023_v45 }
 0x39a   : > { %v1584_v29 = vsel %vm1372_vm3, %v3442_v25, 0.0  ;;  %v1030_v40 = vshrl.u32 %v1015_v26, 16  ;;  %v1046_v41 = vshrl.u32 %v1022_v30, 16 }
 0x39b   : > { %1585 = vadd.xlane.f32.xlu0 %v1584_v29  ;;  %v973_v31 = vcombine.low %v964_v27, %v972_v28  ;;  %v974_v33 = vcombine.high %v964_v27, %v972_v28  ;;  %v1038_v47 = vshrl.u32 %v1023_v34, 16  ;;  %v1054_v55 = vshrl.u32 %v1024_v39, 16 }
 0x39d   : > { %v981_v35 = vrot.slane %v973_v31, %v3364_v36  ;;  %v988_v37 = vrot.slane %v974_v33, %v3364_v36 }
 0x39f   : > { %v3453_v38 = vpop.eup %2761  ;;  %v989_v42 = vcombine.high %v981_v35, %v3023_v45  ;;  %v990_v43 = vcombine.high %v988_v37, %v3023_v45  ;;  %v1027_v44 = vpack.i.b16 %v1015_v26, %v981_v35  ;;  %v1029_v46 = vshrl.u32 %v981_v35, 16 }
 0x3a0   : > { %v1043_v48 = vpack.i.b16 %v1022_v30, %v988_v37  ;;  %v1045_v49 = vshrl.u32 %v988_v37, 16  ;;  %v1587_v50 = vsel %vm1372_vm3, %v3453_v38, 0.0 }
 0x3a1   : > { %v1031_v51 = vpack.i.b16 %v1030_v40, %v1029_v46  ;;  %v1035_v52 = vpack.i.b16 %v1023_v34, %v989_v42  ;;  %v1037_v53 = vshrl.u32 %v989_v42, 16  ;;  %v1051_v54 = vpack.i.b16 %v1024_v39, %v990_v43  ;;  %1588 = vadd.xlane.f32.xlu0 %v1587_v50 }
 0x3a2   : > { %v1047_v56 = vpack.i.b16 %v1046_v41, %v1045_v49  ;;  %v1053_v57 = vshrl.u32 %v990_v43, 16  ;;  %v1057_v58 = vcombine.low %v1027_v44, %v1043_v48 }
 0x3a3   : > { %v3460_v59 = vpop.eup %2763  ;;  %v1039_v60 = vpack.i.b16 %v1038_v47, %v1037_v53  ;;  %v1065_v61 = vcombine.low %v1035_v52, %v1051_v54 }
 0x3a4   : > { %v1055_v62 = vpack.i.b16 %v1054_v55, %v1053_v57  ;;  %v1082_v63 = vcombine.low %v1031_v51, %v1047_v56  ;;  %v1590_v1 = vsel %vm1372_vm3, %v3460_v59, 0.0  ;;  %v1064_v2 = vrot.slane %v1057_v58, %v3361_v32 }
 0x3a5   : > { %v1072_v4 = vrot.slane %v1065_v61, %v3361_v32  ;;  %1591 = vadd.xlane.f32.xlu1 %v1590_v1 }
 0x3a6   : > { %v1090_v5 = vcombine.low %v1039_v60, %v1055_v62  ;;  %v1089_v7 = vrot.slane %v1082_v63, %v3361_v32 }
 0x3a7   : > { %v1073_v6 = vcombine.low %v1064_v2, %v1072_v4 }
 0x3a8   : > { %v1097_v8 = vrot.slane %v1090_v5, %v3361_v32 }
 0x3a9   : > { %v1080_v9 = vrot.slane %v1073_v6, %v3364_v36 }
 0x3aa   : > { %v1098_v10 = vcombine.low %v1089_v7, %v1097_v8 }
 0x3ab   : > { %v1081_v11 = vcombine.high %v1080_v9, %v3023_v45  ;;  %v1111_v15 = vshrl.u32 %v1080_v9, 16 }
 0x3ac   : > { %v1105_v12 = vrot.slane %v1098_v10, %v3364_v36 }
 0x3ad   : > { %v1119_v19 = vshrl.u32 %v1081_v11, 16 }
 0x3ae   : > { %v1106_v13 = vcombine.high %v1105_v12, %v3023_v45  ;;  %v1109_v14 = vpack.i.b16 %v1105_v12, %v1080_v9  ;;  %v1112_v16 = vshrl.u32 %v1105_v12, 16 }
 0x3b0   : > { %v1113_v17 = vpack.i.b16 %v1112_v16, %v1111_v15  ;;  %v1117_v18 = vpack.i.b16 %v1106_v13, %v1081_v11  ;;  %v1120_v21 = vshrl.u32 %v1106_v13, 16  ;;  %1123 = vst.msk [vmem:[#allocation3] sm:$0xf] %vm945_vm2, %v1109_v14  ;;  %v2749_v14 = vld [vmem:[#allocation12] sm:$0xff]  }
 0x3b2   : > { %v1121_v22 = vpack.i.b16 %v1120_v21, %v1119_v19  ;;  %1124 = vst.msk [vmem:[#allocation3 + $0x4] sm:$0xf] %vm945_vm2, %v1113_v17  ;;  %1125 = vst.msk [vmem:[#allocation3 + $0x8] sm:$0xf] %vm945_vm2, %v1117_v18 }
 0x3b4   : > { %1126 = vst.msk [vmem:[#allocation3 + $0xc] sm:$0xf] %vm945_vm2, %v1121_v22 }
 0x3b7   : > { %v1605_v23 = vld [vmem:[#allocation3] sm:$0xf] }
 0x3b8   : > { %v1614_v45 = vsel %vm1612_vm4, %v1605_v23, 0 }
 0x3b9   : > { %2573 = vmatpush3.bf16.msra.mxu1 %v1614_v45  ;;  %v1606_v24 = vld [vmem:[#allocation3 + $0x4] sm:$0xf]  ;;  %v1607_v35 = vld [vmem:[#allocation3 + $0x8] sm:$0xf] }
 0x3ba   : > { %v1660_v26 = vsel %vm1612_vm4, %v1606_v24, 0  ;;  %2584 = vmatprep.subr.bf16.mxu1 %v3016_v0  ;;  %v1706_v41 = vsel %vm1612_vm4, %v1607_v35, 0  ;;  %v2750_v45 = vld [vmem:[#allocation12 + $0x8] sm:$0xff]  }
 0x3bb   : > { %2579 = vmatpush3.bf16.msra.mxu0 %v1660_v26  ;;  %v1608_v40 = vld [vmem:[#allocation3 + $0xc] sm:$0xf] }
 0x3bc   : > { %2590 = vmatprep.subr.bf16.mxu0 %v3016_v0 }
 0x426   : > { %v1583_v27 = vpop.xlane.xlu1 %1582 }
 0x427   : > { %2765 = vrcp.f32 %v1583_v27 }
 0x428   : > { %v1586_v28 = vpop.xlane.xlu0 %1585 }
 0x429   : > { %2767 = vrcp.f32 %v1586_v28 }
 0x42e   : > { %v1589_v29 = vpop.xlane.xlu0 %1588 }
 0x42f   : > { %2769 = vrcp.f32 %v1589_v29 }
 0x431   : > { %v2766_v30 = vpop.eup %2765 }
 0x432   : > { %v1597_v31 = vmul.f32 %v2766_v30, %v3438_v20  ;;  %v1592_v34 = vpop.xlane.xlu1 %1591  ;;  %v1752_v20 = vsel %vm1612_vm4, %v1608_v40, 0 }
 0x433   : > { %v2768_v33 = vpop.eup %2767  ;;  %2771 = vrcp.f32 %v1592_v34 }
 0x434   : > { %v1598_v37 = vmul.f32 %v2768_v33, %v3442_v25  ;;  %v1601_v39 = vpack.c.bf16 %v1597_v31, %v1597_v31 }
 0x436   : > { %2575 = vmatmul.mubr.msk.bf16.vlgmr.msra.gmra.mrb[12].mxu1 %vm1372_vm3, %v1601_v39  ;;  %v1602_v42 = vpack.c.bf16 %v1598_v37, %v1598_v37 }
 0x437   : > { %2585 = vmatpush3.bf16.msra.mxu1 %v1706_v41  ;;  %2586 = vmatprep.mubr.msk.bf16.mxu1 %vm3017_vm1, %v3016_v0 }
 0x438   : > { %2581 = vmatmul.mubr.msk.bf16.vlgmr.msra.gmra.mrb[16].mxu0 %vm1372_vm3, %v1602_v42  ;;  %2596 = vmatprep.subr.bf16.mxu1 %v3016_v0 }
 0x439   : > { %2591 = vmatpush3.bf16.msra.mxu0 %v1752_v20  ;;  %2592 = vmatprep.mubr.msk.bf16.mxu0 %vm3017_vm1, %v3016_v0  ;;  %v2770_v25 = vpop.eup %2769 }
 0x43a   : > { %2604 = vmatprep.subr.bf16.mxu0 %v3016_v0  ;;  %v1599_v43 = vmul.f32 %v2770_v25, %v3453_v38 }
 0x43c   : > { %v1603_v44 = vpack.c.bf16 %v1599_v43, %v1599_v43 }
 0x43d   : > { %v2772_v46 = vpop.eup %2771 }
 0x43e   : > { %v1600_v47 = vmul.f32 %v2772_v46, %v3460_v59  ;;  %2587 = vmatmul.mubr.msk.bf16.vlgmr.msra.gmra.mrb[16].mxu1 %vm1372_vm3, %v1603_v44 }
 0x43f   : > { %2600 = vmatprep.mubr.msk.bf16.mxu1 %vm3017_vm1, %v3016_v0  ;;  %2597 = vmatpush3.bf16.msra.mxu1 %v2749_v14  ;;  %v2472_v14 = vld [vmem:[%s3626_s12] ss:$0 sm:$0xff] }
 0x440   : > { %v1604_v48 = vpack.c.bf16 %v1600_v47, %v1600_v47  ;;  %2598 = vmatprep.subr.bf16.mxu1 %v3016_v0 }
 0x442   : > { %2593 = vmatmul.mubr.msk.bf16.vlgmr.msra.gmra.mrb[20].mxu0 %vm1372_vm3, %v1604_v48  ;;  %v2466_v48 = vld [vmem:[#allocation13] ss:$0 sm:$0xff] }
 0x443   : > { %2608 = vmatprep.mubr.msk.bf16.mxu0 %vm3017_vm1, %v3016_v0  ;;  %2599 = vmatpush3.bf16.msra.mxu1 %v2750_v45 }
 0x444   : > { %2612 = vmatprep.subr.bf16.mxu1 %v3016_v0 }
 0x509   : > { %v1650_v49 = vpop.f32.mrb[12].mxu1 }
 0x50a   : > { %v2576_v50 = vpop.f32.mrb[13].mxu1 }
 0x50b   : > { %v1653_v51 = vpop.f32.mrb[14].mxu1  ;;  %v1696_v52 = vpop.f32.mrb[16].mxu0 }
 0x50c   : > { %v2577_v38 = vpop.f32.mrb[15].mxu1  ;;  %v2582_v53 = vpop.f32.mrb[17].mxu0 }
 0x50d   : > { %v1699_v54 = vpop.f32.mrb[18].mxu0 }
 0x50e   : > { %v2583_v55 = vpop.f32.mrb[19].mxu0 }
 0x511   : > { %v1742_v56 = vpop.f32.mrb[16].mxu1 }
 0x512   : > { %v1794_v57 = vcombine.low %v1650_v49, %v1742_v56  ;;  %v1795_v58 = vcombine.high %v1650_v49, %v1742_v56  ;;  %v2588_v59 = vpop.f32.mrb[17].mxu1 }
 0x513   : > { %v1745_v60 = vpop.f32.mrb[18].mxu1 }
 0x514   : > { %v2589_v61 = vpop.f32.mrb[19].mxu1  ;;  %v1802_v5 = vrot.slane %v1794_v57, %v3361_v32  ;;  %v1809_v6 = vrot.slane %v1795_v58, %v3361_v32  ;;  %v2751_v60 = vld [vmem:[%s3625_s11] sm:$0xff]  }
 0x515   : > { %v1788_v62 = vpop.f32.mrb[20].mxu0  ;;  %2605 = vmatpush3.bf16.msra.mxu0 %v2751_v60  ;;  %v2752_v61 = vld [vmem:[%s3625_s11 + $0x8] sm:$0xff]  }
 0x516   : > { %v1810_v63 = vcombine.low %v1696_v52, %v1788_v62  ;;  %v1811_v1 = vcombine.high %v1696_v52, %v1788_v62  ;;  %v2594_v2 = vpop.f32.mrb[21].mxu0  ;;  %2606 = vmatprep.subr.bf16.mxu0 %v3016_v0  ;;  %v2754_v62 = vld [vmem:[%s3627_s13 + $0x8] sm:$0xff]  }
 0x517   : > { %v1791_v4 = vpop.f32.mrb[22].mxu0 }
 0x518   : > { %v1818_v7 = vrot.slane %v1810_v63, %v3361_v32  ;;  %v1825_v8 = vrot.slane %v1811_v1, %v3361_v32  ;;  %v2595_v9 = vpop.f32.mrb[23].mxu0 }
 0x519   : > { %2607 = vmatpush3.bf16.msra.mxu0 %v2752_v61 }
 0x51a   : > { %v1826_v10 = vcombine.low %v1802_v5, %v1818_v7  ;;  %v1827_v11 = vcombine.high %v1802_v5, %v1818_v7  ;;  %v1842_v12 = vcombine.low %v1809_v6, %v1825_v8  ;;  %v1843_v13 = vcombine.high %v1809_v6, %v1825_v8  ;;  %v2470_v5 = vld [vmem:[#allocation15] ss:$0 sm:$0xff]  ;;  %v2471_v7 = vld [vmem:[%s3624_s10] ss:$0 sm:$0xff] }
 0x51c   : > { %v1834_v15 = vrot.slane %v1826_v10, %v3364_v36  ;;  %v1841_v16 = vrot.slane %v1827_v11, %v3364_v36  ;;  %v1850_v17 = vrot.slane %v1842_v12, %v3364_v36  ;;  %v1857_v18 = vrot.slane %v1843_v13, %v3364_v36  ;;  %v2755_v12 = vld [vmem:[%s3627_s13 + $0x10] sm:$0xff]   ;;  %v2756_v13 = vld [vmem:[%s3627_s13 + $0x18] sm:$0xff]  }
 0x51e   : > { %v1862_v19 = vcombine.low %v1834_v15, %v1841_v16  ;;  %v2464_v21 = vcombine.high %v1834_v15, %v1841_v16  ;;  %v1878_v22 = vcombine.low %v1850_v17, %v1857_v18  ;;  %v2465_v23 = vcombine.high %v1850_v17, %v1857_v18 }
 0x520   : > { %v1869_v24 = vrot.slane %v1862_v19, %v3361_v32  ;;  %v1877_v26 = vrot.slane %v2464_v21, %v3361_v32  ;;  %v1885_v27 = vrot.slane %v1878_v22, %v3361_v32  ;;  %v1893_v28 = vrot.slane %v2465_v23, %v3361_v32  ;;  %v2119_v23 = vld [vmem:[#allocation6] sm:$0xff] }
 0x522   : > { %v1895_v29 = vcombine.high %v1869_v24, %v1877_v26  ;;  %v1911_v30 = vcombine.high %v1885_v27, %v1893_v28  ;;  %v1894_v31 = vcombine.low %v1869_v24, %v1877_v26  ;;  %v1910_v33 = vcombine.low %v1885_v27, %v1893_v28 }
 0x524   : > { %v1909_v34 = vrot.slane %v1895_v29, %v3364_v36  ;;  %v1925_v35 = vrot.slane %v1911_v30, %v3364_v36  ;;  %v1902_v37 = vrot.slane %v1894_v31, %v3364_v36  ;;  %v1918_v39 = vrot.slane %v1910_v33, %v3364_v36  ;;  %v2481_v30 = vld [vmem:[%s3668_s8] ss:$0 sm:$0xff] }
 0x526   : > { %v1928_v40 = vcombine.low %v1909_v34, %v1925_v35  ;;  %v1927_v41 = vcombine.high %v1902_v37, %v1918_v39  ;;  %v1929_v42 = vcombine.high %v1909_v34, %v1925_v35  ;;  %v1926_v20 = vcombine.low %v1902_v37, %v1918_v39 }
 0x528   : > { %1935 = vrot.lane.b32.xlu1 %v1928_v40, %s3024_s27  ;;  %1931 = vrot.lane.b32.xlu0 %v1927_v41, %s3025_s25  ;;  %s2923_s27 = scalar_lea.vmem %s2922_s18, 256 }
 0x529   : > { %p2925_p3 = scmp.lt.s32.totalorder %s2923_s27, %s2917_s17 }
 0x52b   : > { %p2926_p5 = por %p2925_p3, %p2924_p11 }
 0x52c   : > { %1939 = vrot.lane.b32.xlu1 %v1929_v42, %s3026_s23 }
 0x52d   : > { %p2927_p6 = pnand %p2926_p5, %p2920_p10 }
 0x59a   : > { %v1936_v32 = vpop.permute.xlu1 %1935  ;;  %v1932_v25 = vpop.permute.xlu0 %1931 }
 0x59b   : > { %v1942_v43 = vsel %vm1372_vm3, %v1926_v20, %v1932_v25 }
 0x59c   : > { %v1944_v46 = vsel %vm1943_vm5, %v1942_v43, %v1936_v32 }
 0x59e   : > { %v1940_v44 = vpop.permute.xlu1 %1939 }
 0x59f   : > { %v1946_v47 = vsel %vm1945_vm6, %v1944_v46, %v1940_v44 }
 0x5a0   : > { %v1947_v36 = vpack.c.bf16 %v1946_v47, %v1946_v47 }
 0x5a2   : > { %2601 = vmatmul.mubr.msk.bf16.vlgmr.msra.gmra.mrb[20].mxu1 %vm665_vm0, %v1947_v36 }
 0x5a3   : > { %2620 = vmatprep.mubr.msk.bf16.mxu1 %vm3017_vm1, %v3016_v0 }
 0x675   : > { %v2008_v49 = vpop.f32.mrb[20].mxu1 }
 0x676   : > { %v2009_v50 = vadd.f32 %v2466_v48, %v2008_v49  ;;  %v2602_v51 = vpop.f32.mrb[21].mxu1 }
 0x677   : > { %v2011_v52 = vpop.f32.mrb[22].mxu1 }
 0x678   : > { %v2603_v38 = vpop.f32.mrb[23].mxu1  ;;  %v2014_v53 = vadd.f32 %v2009_v50, %v3324_v3  ;;  %v2753_v3 = vld [vmem:[%s3627_s13] sm:$0xff]  }
 0x679   : > { %2613 = vmatpush3.bf16.msra.mxu1 %v2753_v3 }
 0x67a   : > { %v2017_v54 = vsel %vm665_vm0, %v2014_v53, 0.0  ;;  %2614 = vmatprep.subr.bf16.mxu1 %v3016_v0 }
 0x67b   : > { %2018 = vadd.xlane.f32.xlu0 %v2017_v54 }
 0x67d   : > { %2615 = vmatpush3.bf16.msra.mxu1 %v2754_v62 }
 0x67e   : > { %2616 = vmatprep.subr.bf16.mxu1 %v3016_v0 }
 0x681   : > { %2617 = vmatpush3.bf16.msra.mxu1 %v2755_v12 }
 0x682   : > { %2618 = vmatprep.subr.bf16.mxu1 %v3016_v0 }
 0x685   : > { %2619 = vmatpush3.bf16.msra.mxu1 %v2756_v13 }
 0x708   : > { %v2019_v55 = vpop.xlane.xlu0 %2018 }
 0x709   : > { %v2021_v56 = vmul.f32 0.03125, %v2019_v55 }
 0x70b   : > { %v2022_v57 = vsub.f32 %v2014_v53, %v2021_v56 }
 0x70d   : > { %v2023_v58 = vmul.f32 %v2022_v57, %v2022_v57 }
 0x70f   : > { %v2024_v59 = vsel %vm665_vm0, %v2023_v58, 0.0 }
 0x710   : > { %2025 = vadd.xlane.f32.xlu1 %v2024_v59 }
 0x79d   : > { %v2026_v63 = vpop.xlane.xlu1 %2025 }
 0x79e   : > { %v2027_v1 = vmul.f32 0.03125, %v2026_v63 }
 0x7a0   : > { %v2028_v2 = vadd.f32 1e-05, %v2027_v1 }
 0x7a2   : > { %2773 = vrsqrt.f32 %v2028_v2 }
 0x7ac   : > { %v2774_v4 = vpop.eup %2773 }
 0x7ad   : > { %v2030_v6 = vmul.f32 %v2774_v4, %v2022_v57 }
 0x7af   : > { %v2037_v8 = vmul.f32 %v2470_v5, %v2030_v6 }
 0x7b1   : > { %v2044_v9 = vadd.f32 %v2471_v7, %v2037_v8 }
 0x7b3   : > { %2045 = vst.msk [vmem:[#allocation4] sm:$0xff] %vm665_vm0, %v2044_v9  ;;  %v2046_v10 = vpack.c.bf16 %v2044_v9, %v2044_v9 }
 0x7b5   : > { %2048 = vst.msk [vmem:[#allocation5] sm:$0xf] %vm2047_vm7, %v2046_v10 }
 0x7ba   : > { %v2202_v28 = vld [vmem:[#allocation4] sm:$0xff] }
 0x7bc   : > { %v2050_v11 = vld [vmem:[#allocation5] sm:$0xf] }
 0x7bd   : > { %2609 = vmatmul.mubr.msk.bf16.vlgmr.msra.gmra.mrb[24].mxu0 %vm665_vm0, %v2050_v11 }
 0x890   : > { %v2112_v15 = vpop.f32.mrb[24].mxu0 }
 0x891   : > { %v2113_v16 = vadd.f32 %v2472_v14, %v2112_v15  ;;  %v2610_v17 = vpop.f32.mrb[25].mxu0 }
 0x892   : > { %v2115_v18 = vpop.f32.mrb[26].mxu0 }
 0x893   : > { %v2118_v19 = vmax.f32 %v2113_v16, 0.0  ;;  %v2611_v21 = vpop.f32.mrb[27].mxu0 }
 0x895   : > { %v2120_v22 = vpack.c.bf16 %v2118_v19, %v2118_v19 }
 0x897   : > { %2621 = vmatmul.mubr.msk.bf16.vlgmr.msra.gmra.mrb[24].mxu1 %vm2153_vm8, %v2120_v22 }
 0x96a   : > { %v2191_v0 = vpop.f32.mrb[24].mxu1 }
 0x96b   : > { %v2197_v45 = vadd.f32 %v2191_v0, %v2119_v23  ;;  %v2622_v24 = vpop.f32.mrb[25].mxu1 }
 0x96c   : > { %v2194_v26 = vpop.f32.mrb[26].mxu1 }
 0x96d   : > { %2198 = vst.msk [vmem:[#allocation6] sm:$0xff] %vm665_vm0, %v2197_v45  ;;  %v2623_v27 = vpop.f32.mrb[27].mxu1 }
 0x974   : > { %v2203_v29 = vld [vmem:[#allocation6] sm:$0xff] }
 0x975   : > { %v2204_v31 = vadd.f32 %v2203_v29, %v2202_v28 }
 0x977   : > { %v2212_v33 = vadd.f32 %v2481_v30, %v2204_v31 }
 0x979   : > { %v2215_v34 = vsel %vm665_vm0, %v2212_v33, 0.0 }
 0x97a   : > { %2216 = vadd.xlane.f32.xlu0 %v2215_v34 }
 0xa07   : > { %v2217_v35 = vpop.xlane.xlu0 %2216 }
 0xa08   : > { %v2219_v37 = vmul.f32 0.03125, %v2217_v35 }
 0xa0a   : > { %v2220_v39 = vsub.f32 %v2212_v33, %v2219_v37 }
 0xa0c   : > { %v2221_v40 = vmul.f32 %v2220_v39, %v2220_v39 }
 0xa0e   : > { %v2222_v41 = vsel %vm665_vm0, %v2221_v40, 0.0 }
 0xa0f   : > { %2223 = vadd.xlane.f32.xlu0 %v2222_v41 }
 0xa9c   : > { %v2224_v42 = vpop.xlane.xlu0 %2223 }
 0xa9d   : > { %v2225_v20 = vmul.f32 0.03125, %v2224_v42 }
 0xa9f   : > { %v2226_v32 = vadd.f32 1e-05, %v2225_v20 }
 0xaa1   : > { %2775 = vrsqrt.f32 %v2226_v32 }
 0xaab   : > { %v2776_v25 = vpop.eup %2775 }
 0xaac   : > { %v2228_v43 = vmul.f32 %v2776_v25, %v2220_v39 }
 0xaae   : > { %v2235_v44 = vmul.f32 %v2470_v5, %v2228_v43 }
 0xab0   : > { %v2242_v46 = vadd.f32 %v2471_v7, %v2235_v44 }
 0xab2   : > { %2243 = vst.msk [vmem:[%s613_s22] sm:$0xff] %vm665_vm0, %v2242_v46 }
 0xab3   : > { %2930 = shalt.err (!%p2927_p6)
}
 0xab4   : > { %s2931_s25 = scalar_lea.hbm %s3566_s26, 128  ;;  %s2935_s14 = scalar_lea.hbm %s3671_s30, 256 }
 0xab5   : > { %p2932_p7 = scmp.ne.s32.totalorder %s3566_s26, %s2931_s25  ;;  %p2936_p0 = scmp.lt.u32.totalorder %s3566_s26, %s3671_s30 }
 0xab6   : > { %p2937_p1 = scmp.lt.u32.totalorder %s2935_s14, %s2931_s25  ;;  %p2939_p2 = scmp.lt.u32.totalorder %s2931_s25, %s3566_s26 }
 0xab7   : > { %p2933_p9 = pnand %p2932_p7, %p3672_p4 }
 0xab8   : > { %p2938_p13 = por %p2937_p1, %p2936_p0 }
 0xab9   : > { %p2934_p12 = pneg %p2933_p9 }
 0xaba   : > { %p2940_p8 = por %p2939_p2, %p2938_p13 }
 0xabc   : > { %p2941_p10 = pnand %p2940_p8, %p2934_p12 }
 0xabe   : > { %2944 = shalt.err (!%p2941_p10)
}
 0xabf   : > { %2644 = dma.vmem_to_hbm [thread:$0]  (%p3672_p4), %s3568_s6, 128, %s3566_s26, %s2245_s24  }
 0xac0 PF: > { %s3673_s19 = sld [smem:[#allocation25_spill]]  ;;  %s3674_s22 = sld [smem:[#allocation21_spill]] }
 0xac1   : > { %s3675_s15 = sld [smem:[#allocation28_spill]] }
 0xac6   : > { %p2676_p11 = scmp.ge.s32.totalorder %s3673_s19, 2  ;;  %s2271_s28 = sand.u32 1, %s3674_s22  }
 0xac7   : > { %p3676_p3 = scmp.ne.s32.totalorder %s3675_s15, 0  ;;  %s2272_s17 = scalar_lea.sflag [#allocation9], %s2271_s28 }
 0xac9   : > { %p2663_p5 = pnand %p2676_p11, %p3676_p3 }
 0xacb   : > { %2982 = dma.done.wait (!%p2663_p5), %s2272_s17, 128  }
 0xacc   : > { %2984 = vsyncadd (!%p2663_p5), %s2272_s17, 4294967168  ;;  %s31_s23 = sadd.s32 1, %s3673_s19   ;;  %s3677_s18 = sld [smem:[#allocation22_spill]] }
 0xacd   : > { %p28_p6 = scmp.ge.s32.totalorder %s31_s23, 4   ;;  %s3678_s19 = sld [smem:[#allocation23_spill]] }
 0xace   : > { %s3679_s20 = sld [smem:[#allocation29_spill]]  ;;  %s3680_s21 = sld [smem:[#allocation24_spill]] }
 0xacf   : > { %s3681_s22 = sld [smem:[#allocation26_spill]]  ;;  %30 = sbr.rel (!%p28_p6) target bundleno = 12 (0xc), region = 158 }
 0xad6   :  { %2277 = vsyncpa [#allocation8], 1 }
 0xad7   :  { %2279 = vsyncpa [#allocation8 + $0x1], 1 }
 0xad8   :  { %2280 = vsyncpa [#allocation11], 1 }
 0xad9   :  { %2281 = vsyncpa [#allocation14], 1 }
 0xada   :  { %2282 = vsyncpa [#allocation9], 1 }
 0xadb   :  { %2284 = vsyncpa [#allocation9 + $0x1], 1 }

</bundles_post_ra>
